<compile_context>
chip_gen: v7x
topology: tpu7x:2x2x1
jax: 0.10.0
libtpu: 0.0.40
codegen_flags: <defaults>
</compile_context>

<pallas_src>
import functools

import jax
import jax.numpy as jnp
from jax.experimental import pallas as pl
from jax.experimental import pallas as _pl_unused  # noqa: F401
from jax.experimental.pallas import tpu as pltpu  # noqa: F401  (imported per guidelines)


# ---------------- Pallas kernel ----------------

def _full_spec(shape):
    return pl.BlockSpec(shape, lambda: (0,) * len(shape))


def _gnngl_fused_kernel(w_ref, src_ref, seg_ref,
                        q1w_ref, q1b_ref, q2w_ref, q2b_ref,
                        adj_ref, c1w_ref, c1b_ref,
                        c2w_ref, c2b_ref,
                        lw_ref, lb_ref, o_ref, *,
                        num_blocks, num_nodes, seq_length, emb_size):
    f32 = jnp.float32
    eps2 = 1e-24                       # (F.normalize eps = 1e-12) squared
    es = emb_size * seq_length         # flat feature width (lane-dense slab)

    def _dot(a, b):
        return jnp.dot(a, b, preferred_element_type=f32)

    # --- in-kernel constants (no HBM DMA; built from iotas on the VPU) --------
    # Flat column k of the (N, emb*seq) buffer corresponds to torch-view
    # coordinates (emb = k // seq, seq-slot = k % seq) of .view(-1, emb, seq).
    # msum[k, j] = 1  iff  k % S == j        (strided sum-of-squares reducer)
    k2 = jax.lax.broadcasted_iota(jnp.int32, (es, seq_length), 0)
    j2 = jax.lax.broadcasted_iota(jnp.int32, (es, seq_length), 1)
    msum = jnp.where(k2 % seq_length == j2, 1.0, 0.0).astype(f32)      # (ES, S)
    # mexp[j, k] = 1  iff  k % S == j        (broadcast back to the flat slab)
    j1 = jax.lax.broadcasted_iota(jnp.int32, (seq_length, es), 0)
    k1 = jax.lax.broadcasted_iota(jnp.int32, (seq_length, es), 1)
    mexp = jnp.where(k1 % seq_length == j1, 1.0, 0.0).astype(f32)      # (S, ES)
    # gsum[k, i] = 1  iff  k // S == i       (per-emb group sum; written as a
    # range test so no integer division is needed)
    k3 = jax.lax.broadcasted_iota(jnp.int32, (es, emb_size), 0)
    i3 = jax.lax.broadcasted_iota(jnp.int32, (es, emb_size), 1)
    d3 = k3 - i3 * seq_length
    gsum = jnp.where((d3 >= 0) & (d3 < seq_length), 1.0, 0.0).astype(f32)  # (ES, E)

    def _normalize_view(v, w_row=None):
        # F.normalize(dim=1) of the torch .view(-1, emb, seq) reinterpretation of
        # the flat (N, ES) buffer v; optionally pre-scaled per seq slot by w_row.
        # Both the strided sum-of-squares and the broadcast back are tiny matmuls
        # so all elementwise math stays 128-lane dense; 1/||.|| uses rsqrt (EUP).
        vv = v * v
        if w_row is None:
            ss = _dot(vv, msum)                                        # (N, S)
            scale = _dot(jax.lax.rsqrt(jnp.maximum(ss, eps2)), mexp)   # (N, ES)
        else:
            # ||w_j * x_col||^2 = w_j^2 * ||x_col||^2  (fold w into the reducer)
            ss = _dot(vv, msum * (w_row * w_row))
            # normalized value = x * (w_j / max(||w_j x_col||, eps))
            scale = _dot(jax.lax.rsqrt(jnp.maximum(ss, eps2)) * w_row, mexp)
        return v * scale

    # --- LiteratureEmbedding --------------------------------------------------
    f = _dot(_normalize_view(src_ref[...], w_ref[...])
             + _normalize_view(seg_ref[...]), gsum)                    # (N, E)

    # --- query_mlp: Linear -> ReLU -> Linear ----------------------------------
    h = jnp.maximum(_dot(f, q1w_ref[...]) + q1b_ref[...], 0.0)
    x = _dot(h, q2w_ref[...]) + q2b_ref[...]

    # --- graph convolutions (mean aggregation, relu fused) --------------------
    # adj_ref is the ((R+1)*N, N) stack [A_0; ...; A_{R-1}; I]: a single matmul
    # produces A_r @ X for every relation AND the root/self term at once; the
    # matching weight stack has the root weight appended as its last block.
    def conv(xin, w_stack_ref, b_ref):
        ax_all = _dot(adj_ref[...], xin)                               # ((R+1)*N, Cin)
        acc = b_ref[...]
        for r in range(num_blocks):                                    # static unroll
            acc = acc + _dot(ax_all[r * num_nodes:(r + 1) * num_nodes, :],
                             w_stack_ref[r])
        return jnp.maximum(acc, 0.0)

    x = conv(x, c1w_ref, c1b_ref)
    x = conv(x, c2w_ref, c2b_ref)

    # --- final linear ----------------------------------------------------------
    # TODO(synk): torch.nn.Dropout(0.5) is modeled as identity (inference mode).
    o_ref[...] = _dot(x, lw_ref[...]) + lb_ref[...]


# ---------------- parameter init & model glue ----------------

def init_params(key, vocab_size, seq_length, emb_size, gnn_hidden, text_hidden, class_num):
    ks = jax.random.split(key, 11)

    def lin(k, cin, cout):
        kw, kb = jax.random.split(k)
        return (jax.random.normal(kw, (cin, cout), jnp.float32) * 0.1,
                jax.random.normal(kb, (1, cout), jnp.float32) * 0.1)

    p = {}
    p["src_emb"] = jax.random.normal(ks[0], (vocab_size, emb_size), jnp.float32)
    p["seg_emb"] = jax.random.normal(ks[1], (3, emb_size), jnp.float32)
    p["lit_w"] = jnp.ones((seq_length,), jnp.float32)            # torch.ones init
    p["q1_w"], p["q1_b"] = lin(ks[2], emb_size, text_hidden)     # query_mlp[0]
    p["q2_w"], p["q2_b"] = lin(ks[3], text_hidden, emb_size)     # query_mlp[2]
    # Relation weights with the root/self weight appended as the LAST block so it
    # contracts against the identity block appended to the adjacency stack.
    c1_w = jax.random.normal(ks[4], (class_num, emb_size, gnn_hidden), jnp.float32) * 0.1
    c1_root = jax.random.normal(ks[5], (1, emb_size, gnn_hidden), jnp.float32) * 0.1
    p["c1_w_aug"] = jnp.concatenate([c1_w, c1_root], axis=0)     # (R+1, E, GH)
    p["c1_b"] = jax.random.normal(ks[6], (1, gnn_hidden), jnp.float32) * 0.1
    c2_w = jax.random.normal(ks[7], (class_num, gnn_hidden, emb_size), jnp.float32) * 0.1
    c2_root = jax.random.normal(ks[8], (1, gnn_hidden, emb_size), jnp.float32) * 0.1
    p["c2_w_aug"] = jnp.concatenate([c2_w, c2_root], axis=0)     # (R+1, GH, E)
    p["c2_b"] = jax.random.normal(ks[9], (1, emb_size), jnp.float32) * 0.1
    p["lin_w"], p["lin_b"] = lin(ks[10], emb_size, emb_size)
    return p


def build_rel_adj_aug(edge_index, edge_type, num_nodes, num_relations):
    """Graph-static precompute (run ONCE per graph): stacked mean-normalised
    per-relation adjacency with an identity block appended for the root term."""
    # PyG convention: edge_index[0]=source, edge_index[1]=target; mean aggr at target.
    src_n, dst_n = edge_index[0], edge_index[1]
    A = jnp.zeros((num_relations, num_nodes, num_nodes), jnp.float32)
    A = A.at[edge_type, dst_n, src_n].add(1.0)
    deg = jnp.sum(A, axis=2, keepdims=True)
    A = A / jnp.maximum(deg, 1.0)            # scatter-mean; isolated nodes -> 0
    A = A.reshape(num_relations * num_nodes, num_nodes)
    return jnp.concatenate([A, jnp.eye(num_nodes, dtype=jnp.float32)], axis=0)


def gnngl_forward(params, src, seg, adj_aug):
    N, S = src.shape
    E = params["src_emb"].shape[1]

    # Embedding gathers (glue, same jit as the kernel).  Row-major flatten of the
    # gathered (N, S, E) buffer is exactly the buffer torch's .view(-1, E, S)
    # reinterprets: flat column k <-> view coords (emb = k // S, seq = k % S).
    src_flat = params["src_emb"][src].reshape(N, S * E)            # (N, emb*seq)
    seg_flat = params["seg_emb"][seg].reshape(N, S * E)
    w_row = params["lit_w"].reshape(1, S)

    operands = (w_row, src_flat, seg_flat,
                params["q1_w"], params["q1_b"], params["q2_w"], params["q2_b"],
                adj_aug,
                params["c1_w_aug"], params["c1_b"],
                params["c2_w_aug"], params["c2_b"],
                params["lin_w"], params["lin_b"])

    kernel = functools.partial(
        _gnngl_fused_kernel,
        num_blocks=params["c1_w_aug"].shape[0],   # R + 1
        num_nodes=N, seq_length=S, emb_size=E)

    fused = pl.pallas_call(
        kernel,
        out_shape=jax.ShapeDtypeStruct((N, E), jnp.float32),
        in_specs=[_full_spec(t.shape) for t in operands],
        out_specs=_full_spec((N, E)),
    )
    return fused(*operands)


if __name__ == "__main__":
    vocab_size, seq_length, emb_size = 50, 8, 32
    gnn_hidden, text_hidden, class_num = 32, 32, 3
    num_nodes, num_edges = 16, 40

    key = jax.random.PRNGKey(0)
    k_src, k_seg, k_ei, k_et, k_par = jax.random.split(key, 5)
    src = jax.random.randint(k_src, (num_nodes, seq_length), 0, vocab_size, jnp.int32)
    seg = jax.random.randint(k_seg, (num_nodes, seq_length), 0, 3, jnp.int32)
    edge_index = jax.random.randint(k_ei, (2, num_edges), 0, num_nodes, jnp.int32)
    edge_type = jax.random.randint(k_et, (num_edges,), 0, class_num, jnp.int32)

    params = init_params(k_par, vocab_size, seq_length, emb_size,
                         gnn_hidden, text_hidden, class_num)

    # Graph structure is static for this model -> hoist the adjacency build out
    # of the per-call path (built once, reused for every forward call).
    adj_aug = build_rel_adj_aug(edge_index, edge_type, num_nodes, class_num)

    fwd = jax.jit(gnngl_forward)
    out = fwd(params, src, seg, adj_aug)
    out = jax.block_until_ready(out)
    assert out.shape == (num_nodes, emb_size)
    assert bool(jnp.all(jnp.isfinite(out)))
    print("KERNEL_OK")
</pallas_src>

<mosaic_0001>
module attributes {stable_mosaic.version = 11 : i64} {
  func.func @_gnngl_fused_kernel(%arg0: memref<1x8xf32, #tpu.memory_space<vmem>>, %arg1: memref<16x256xf32, #tpu.memory_space<vmem>>, %arg2: memref<16x256xf32, #tpu.memory_space<vmem>>, %arg3: memref<32x32xf32, #tpu.memory_space<vmem>>, %arg4: memref<1x32xf32, #tpu.memory_space<vmem>>, %arg5: memref<32x32xf32, #tpu.memory_space<vmem>>, %arg6: memref<1x32xf32, #tpu.memory_space<vmem>>, %arg7: memref<64x16xf32, #tpu.memory_space<vmem>>, %arg8: memref<4x32x32xf32, #tpu.memory_space<vmem>>, %arg9: memref<1x32xf32, #tpu.memory_space<vmem>>, %arg10: memref<4x32x32xf32, #tpu.memory_space<vmem>>, %arg11: memref<1x32xf32, #tpu.memory_space<vmem>>, %arg12: memref<32x32xf32, #tpu.memory_space<vmem>>, %arg13: memref<1x32xf32, #tpu.memory_space<vmem>>, %arg14: memref<16x32xf32, #tpu.memory_space<vmem>>) attributes {dimension_semantics = [], scalar_prefetch = 0 : i64, scratch_operands = 0 : i64, tpu.core_type = #tpu.core_type<tc>} {
    %0 = tpu.iota {dimensions = array<i32: 0>} : vector<256x8xi32>
    %1 = tpu.iota {dimensions = array<i32: 1>} : vector<256x8xi32>
    %c8_i32 = arith.constant 8 : i32
    %c0_i32 = arith.constant 0 : i32
    %2 = arith.cmpi eq, %c8_i32, %c0_i32 : i32
    %c1_i32 = arith.constant 1 : i32
    %3 = arith.select %2, %c1_i32, %c8_i32 : i32
    %4 = vector.broadcast %3 : i32 to vector<256x8xi32>
    %5 = arith.remsi %0, %4 : vector<256x8xi32>
    %c0_i32_0 = arith.constant 0 : i32
    %6 = vector.broadcast %c0_i32_0 : i32 to vector<256x8xi32>
    %7 = arith.cmpi ne, %5, %6 : vector<256x8xi32>
    %c0_i32_1 = arith.constant 0 : i32
    %8 = vector.broadcast %c0_i32_1 : i32 to vector<256x8xi32>
    %9 = arith.cmpi slt, %5, %8 : vector<256x8xi32>
    %c0_i32_2 = arith.constant 0 : i32
    %10 = arith.cmpi slt, %3, %c0_i32_2 : i32
    %11 = vector.broadcast %10 : i1 to vector<256x8xi1>
    %12 = vector.broadcast %11 : vector<256x8xi1> to vector<256x8xi1>
    %13 = arith.xori %9, %12 : vector<256x8xi1>
    %14 = arith.andi %13, %7 : vector<256x8xi1>
    %15 = vector.broadcast %3 : i32 to vector<256x8xi32>
    %16 = arith.addi %5, %15 : vector<256x8xi32>
    %17 = arith.select %14, %16, %5 : vector<256x8xi1>, vector<256x8xi32>
    %18 = arith.cmpi eq, %17, %1 : vector<256x8xi32>
    %cst = arith.constant 1.000000e+00 : f32
    %cst_3 = arith.constant 0.000000e+00 : f32
    %19 = vector.broadcast %cst : f32 to vector<256x8xf32>
    %20 = vector.broadcast %cst_3 : f32 to vector<256x8xf32>
    %21 = arith.select %18, %19, %20 : vector<256x8xi1>, vector<256x8xf32>
    %22 = tpu.iota {dimensions = array<i32: 0>} : vector<8x256xi32>
    %23 = tpu.iota {dimensions = array<i32: 1>} : vector<8x256xi32>
    %c8_i32_4 = arith.constant 8 : i32
    %c0_i32_5 = arith.constant 0 : i32
    %24 = arith.cmpi eq, %c8_i32_4, %c0_i32_5 : i32
    %c1_i32_6 = arith.constant 1 : i32
    %25 = arith.select %24, %c1_i32_6, %c8_i32_4 : i32
    %26 = vector.broadcast %25 : i32 to vector<8x256xi32>
    %27 = arith.remsi %23, %26 : vector<8x256xi32>
    %c0_i32_7 = arith.constant 0 : i32
    %28 = vector.broadcast %c0_i32_7 : i32 to vector<8x256xi32>
    %29 = arith.cmpi ne, %27, %28 : vector<8x256xi32>
    %c0_i32_8 = arith.constant 0 : i32
    %30 = vector.broadcast %c0_i32_8 : i32 to vector<8x256xi32>
    %31 = arith.cmpi slt, %27, %30 : vector<8x256xi32>
    %c0_i32_9 = arith.constant 0 : i32
    %32 = arith.cmpi slt, %25, %c0_i32_9 : i32
    %33 = vector.broadcast %32 : i1 to vector<8x256xi1>
    %34 = vector.broadcast %33 : vector<8x256xi1> to vector<8x256xi1>
    %35 = arith.xori %31, %34 : vector<8x256xi1>
    %36 = arith.andi %35, %29 : vector<8x256xi1>
    %37 = vector.broadcast %25 : i32 to vector<8x256xi32>
    %38 = arith.addi %27, %37 : vector<8x256xi32>
    %39 = arith.select %36, %38, %27 : vector<8x256xi1>, vector<8x256xi32>
    %40 = arith.cmpi eq, %39, %22 : vector<8x256xi32>
    %cst_10 = arith.constant 1.000000e+00 : f32
    %cst_11 = arith.constant 0.000000e+00 : f32
    %41 = vector.broadcast %cst_10 : f32 to vector<8x256xf32>
    %42 = vector.broadcast %cst_11 : f32 to vector<8x256xf32>
    %43 = arith.select %40, %41, %42 : vector<8x256xi1>, vector<8x256xf32>
    %44 = tpu.iota {dimensions = array<i32: 0>} : vector<256x32xi32>
    %45 = tpu.iota {dimensions = array<i32: 1>} : vector<256x32xi32>
    %c8_i32_12 = arith.constant 8 : i32
    %46 = vector.broadcast %c8_i32_12 : i32 to vector<256x32xi32>
    %47 = arith.muli %45, %46 : vector<256x32xi32>
    %48 = arith.subi %44, %47 : vector<256x32xi32>
    %c0_i32_13 = arith.constant 0 : i32
    %49 = vector.broadcast %c0_i32_13 : i32 to vector<256x32xi32>
    %50 = arith.cmpi sge, %48, %49 : vector<256x32xi32>
    %c8_i32_14 = arith.constant 8 : i32
    %51 = vector.broadcast %c8_i32_14 : i32 to vector<256x32xi32>
    %52 = arith.cmpi slt, %48, %51 : vector<256x32xi32>
    %53 = arith.andi %50, %52 : vector<256x32xi1>
    %cst_15 = arith.constant 1.000000e+00 : f32
    %cst_16 = arith.constant 0.000000e+00 : f32
    %54 = vector.broadcast %cst_15 : f32 to vector<256x32xf32>
    %55 = vector.broadcast %cst_16 : f32 to vector<256x32xf32>
    %56 = arith.select %53, %54, %55 : vector<256x32xi1>, vector<256x32xf32>
    %c0 = arith.constant 0 : index
    %c0_17 = arith.constant 0 : index
    %57 = vector.load %arg1[%c0, %c0_17] : memref<16x256xf32, #tpu.memory_space<vmem>>, vector<16x256xf32>
    %c0_18 = arith.constant 0 : index
    %c0_19 = arith.constant 0 : index
    %58 = vector.load %arg0[%c0_18, %c0_19] : memref<1x8xf32, #tpu.memory_space<vmem>>, vector<1x8xf32>
    %59 = arith.mulf %57, %57 : vector<16x256xf32>
    %60 = arith.mulf %58, %58 : vector<1x8xf32>
    %61 = vector.broadcast %60 : vector<1x8xf32> to vector<256x8xf32>
    %62 = arith.mulf %21, %61 : vector<256x8xf32>
    %cst_20 = arith.constant dense<0.000000e+00> : vector<16x8xf32>
    %63 = tpu.matmul %59, %62, %cst_20 {dimension_numbers = #tpu.dot_dimension_numbers<[1], [0], [0], [1], [0, 0, 1, 1], [], []>} : vector<16x256xf32>, vector<256x8xf32>, vector<16x8xf32> -> vector<16x8xf32>
    %cst_21 = arith.constant 1.000000e-24 : f32
    %64 = vector.broadcast %cst_21 : f32 to vector<16x8xf32>
    %65 = arith.maximumf %63, %64 : vector<16x8xf32>
    %66 = math.rsqrt %65 : vector<16x8xf32>
    %67 = vector.broadcast %58 : vector<1x8xf32> to vector<16x8xf32>
    %68 = arith.mulf %66, %67 : vector<16x8xf32>
    %cst_22 = arith.constant dense<0.000000e+00> : vector<16x256xf32>
    %69 = tpu.matmul %68, %43, %cst_22 {dimension_numbers = #tpu.dot_dimension_numbers<[1], [0], [0], [1], [0, 0, 1, 1], [], []>} : vector<16x8xf32>, vector<8x256xf32>, vector<16x256xf32> -> vector<16x256xf32>
    %70 = arith.mulf %57, %69 : vector<16x256xf32>
    %c0_23 = arith.constant 0 : index
    %c0_24 = arith.constant 0 : index
    %71 = vector.load %arg2[%c0_23, %c0_24] : memref<16x256xf32, #tpu.memory_space<vmem>>, vector<16x256xf32>
    %72 = arith.mulf %71, %71 : vector<16x256xf32>
    %cst_25 = arith.constant dense<0.000000e+00> : vector<16x8xf32>
    %73 = tpu.matmul %72, %21, %cst_25 {dimension_numbers = #tpu.dot_dimension_numbers<[1], [0], [0], [1], [0, 0, 1, 1], [], []>} : vector<16x256xf32>, vector<256x8xf32>, vector<16x8xf32> -> vector<16x8xf32>
    %cst_26 = arith.constant 1.000000e-24 : f32
    %74 = vector.broadcast %cst_26 : f32 to vector<16x8xf32>
    %75 = arith.maximumf %73, %74 : vector<16x8xf32>
    %76 = math.rsqrt %75 : vector<16x8xf32>
    %cst_27 = arith.constant dense<0.000000e+00> : vector<16x256xf32>
    %77 = tpu.matmul %76, %43, %cst_27 {dimension_numbers = #tpu.dot_dimension_numbers<[1], [0], [0], [1], [0, 0, 1, 1], [], []>} : vector<16x8xf32>, vector<8x256xf32>, vector<16x256xf32> -> vector<16x256xf32>
    %78 = arith.mulf %71, %77 : vector<16x256xf32>
    %79 = arith.addf %70, %78 : vector<16x256xf32>
    %cst_28 = arith.constant dense<0.000000e+00> : vector<16x32xf32>
    %80 = tpu.matmul %79, %56, %cst_28 {dimension_numbers = #tpu.dot_dimension_numbers<[1], [0], [0], [1], [0, 0, 1, 1], [], []>} : vector<16x256xf32>, vector<256x32xf32>, vector<16x32xf32> -> vector<16x32xf32>
    %c0_29 = arith.constant 0 : index
    %c0_30 = arith.constant 0 : index
    %81 = vector.load %arg3[%c0_29, %c0_30] : memref<32x32xf32, #tpu.memory_space<vmem>>, vector<32x32xf32>
    %cst_31 = arith.constant dense<0.000000e+00> : vector<16x32xf32>
    %82 = tpu.matmul %80, %81, %cst_31 {dimension_numbers = #tpu.dot_dimension_numbers<[1], [0], [0], [1], [0, 0, 1, 1], [], []>} : vector<16x32xf32>, vector<32x32xf32>, vector<16x32xf32> -> vector<16x32xf32>
    %c0_32 = arith.constant 0 : index
    %c0_33 = arith.constant 0 : index
    %83 = vector.load %arg4[%c0_32, %c0_33] : memref<1x32xf32, #tpu.memory_space<vmem>>, vector<1x32xf32>
    %84 = vector.broadcast %83 : vector<1x32xf32> to vector<16x32xf32>
    %85 = arith.addf %82, %84 : vector<16x32xf32>
    %cst_34 = arith.constant 0.000000e+00 : f32
    %86 = vector.broadcast %cst_34 : f32 to vector<16x32xf32>
    %87 = arith.maximumf %85, %86 : vector<16x32xf32>
    %c0_35 = arith.constant 0 : index
    %c0_36 = arith.constant 0 : index
    %88 = vector.load %arg5[%c0_35, %c0_36] : memref<32x32xf32, #tpu.memory_space<vmem>>, vector<32x32xf32>
    %cst_37 = arith.constant dense<0.000000e+00> : vector<16x32xf32>
    %89 = tpu.matmul %87, %88, %cst_37 {dimension_numbers = #tpu.dot_dimension_numbers<[1], [0], [0], [1], [0, 0, 1, 1], [], []>} : vector<16x32xf32>, vector<32x32xf32>, vector<16x32xf32> -> vector<16x32xf32>
    %c0_38 = arith.constant 0 : index
    %c0_39 = arith.constant 0 : index
    %90 = vector.load %arg6[%c0_38, %c0_39] : memref<1x32xf32, #tpu.memory_space<vmem>>, vector<1x32xf32>
    %91 = vector.broadcast %90 : vector<1x32xf32> to vector<16x32xf32>
    %92 = arith.addf %89, %91 : vector<16x32xf32>
    %c0_40 = arith.constant 0 : index
    %c0_41 = arith.constant 0 : index
    %93 = vector.load %arg7[%c0_40, %c0_41] : memref<64x16xf32, #tpu.memory_space<vmem>>, vector<64x16xf32>
    %cst_42 = arith.constant dense<0.000000e+00> : vector<64x32xf32>
    %94 = tpu.matmul %93, %92, %cst_42 {dimension_numbers = #tpu.dot_dimension_numbers<[1], [0], [0], [1], [0, 0, 1, 1], [], []>} : vector<64x16xf32>, vector<16x32xf32>, vector<64x32xf32> -> vector<64x32xf32>
    %c0_43 = arith.constant 0 : index
    %c0_44 = arith.constant 0 : index
    %95 = vector.load %arg9[%c0_43, %c0_44] : memref<1x32xf32, #tpu.memory_space<vmem>>, vector<1x32xf32>
    %96 = vector.extract_strided_slice %94 {offsets = [0, 0], sizes = [16, 32], strides = [1, 1]} : vector<64x32xf32> to vector<16x32xf32>
    %c0_45 = arith.constant 0 : index
    %c0_46 = arith.constant 0 : index
    %c0_47 = arith.constant 0 : index
    %97 = vector.load %arg8[%c0_45, %c0_46, %c0_47] : memref<4x32x32xf32, #tpu.memory_space<vmem>>, vector<1x32x32xf32>
    %98 = vector.shape_cast %97 : vector<1x32x32xf32> to vector<32x32xf32>
    %cst_48 = arith.constant dense<0.000000e+00> : vector<16x32xf32>
    %99 = tpu.matmul %96, %98, %cst_48 {dimension_numbers = #tpu.dot_dimension_numbers<[1], [0], [0], [1], [0, 0, 1, 1], [], []>} : vector<16x32xf32>, vector<32x32xf32>, vector<16x32xf32> -> vector<16x32xf32>
    %100 = vector.broadcast %95 : vector<1x32xf32> to vector<16x32xf32>
    %101 = arith.addf %100, %99 : vector<16x32xf32>
    %102 = vector.extract_strided_slice %94 {offsets = [16, 0], sizes = [16, 32], strides = [1, 1]} : vector<64x32xf32> to vector<16x32xf32>
    %c1 = arith.constant 1 : index
    %c0_49 = arith.constant 0 : index
    %c0_50 = arith.constant 0 : index
    %103 = vector.load %arg8[%c1, %c0_49, %c0_50] : memref<4x32x32xf32, #tpu.memory_space<vmem>>, vector<1x32x32xf32>
    %104 = vector.shape_cast %103 : vector<1x32x32xf32> to vector<32x32xf32>
    %cst_51 = arith.constant dense<0.000000e+00> : vector<16x32xf32>
    %105 = tpu.matmul %102, %104, %cst_51 {dimension_numbers = #tpu.dot_dimension_numbers<[1], [0], [0], [1], [0, 0, 1, 1], [], []>} : vector<16x32xf32>, vector<32x32xf32>, vector<16x32xf32> -> vector<16x32xf32>
    %106 = arith.addf %101, %105 : vector<16x32xf32>
    %107 = vector.extract_strided_slice %94 {offsets = [32, 0], sizes = [16, 32], strides = [1, 1]} : vector<64x32xf32> to vector<16x32xf32>
    %c2 = arith.constant 2 : index
    %c0_52 = arith.constant 0 : index
    %c0_53 = arith.constant 0 : index
    %108 = vector.load %arg8[%c2, %c0_52, %c0_53] : memref<4x32x32xf32, #tpu.memory_space<vmem>>, vector<1x32x32xf32>
    %109 = vector.shape_cast %108 : vector<1x32x32xf32> to vector<32x32xf32>
    %cst_54 = arith.constant dense<0.000000e+00> : vector<16x32xf32>
    %110 = tpu.matmul %107, %109, %cst_54 {dimension_numbers = #tpu.dot_dimension_numbers<[1], [0], [0], [1], [0, 0, 1, 1], [], []>} : vector<16x32xf32>, vector<32x32xf32>, vector<16x32xf32> -> vector<16x32xf32>
    %111 = arith.addf %106, %110 : vector<16x32xf32>
    %112 = vector.extract_strided_slice %94 {offsets = [48, 0], sizes = [16, 32], strides = [1, 1]} : vector<64x32xf32> to vector<16x32xf32>
    %c3 = arith.constant 3 : index
    %c0_55 = arith.constant 0 : index
    %c0_56 = arith.constant 0 : index
    %113 = vector.load %arg8[%c3, %c0_55, %c0_56] : memref<4x32x32xf32, #tpu.memory_space<vmem>>, vector<1x32x32xf32>
    %114 = vector.shape_cast %113 : vector<1x32x32xf32> to vector<32x32xf32>
    %cst_57 = arith.constant dense<0.000000e+00> : vector<16x32xf32>
    %115 = tpu.matmul %112, %114, %cst_57 {dimension_numbers = #tpu.dot_dimension_numbers<[1], [0], [0], [1], [0, 0, 1, 1], [], []>} : vector<16x32xf32>, vector<32x32xf32>, vector<16x32xf32> -> vector<16x32xf32>
    %116 = arith.addf %111, %115 : vector<16x32xf32>
    %cst_58 = arith.constant 0.000000e+00 : f32
    %117 = vector.broadcast %cst_58 : f32 to vector<16x32xf32>
    %118 = arith.maximumf %116, %117 : vector<16x32xf32>
    %c0_59 = arith.constant 0 : index
    %c0_60 = arith.constant 0 : index
    %119 = vector.load %arg7[%c0_59, %c0_60] : memref<64x16xf32, #tpu.memory_space<vmem>>, vector<64x16xf32>
    %cst_61 = arith.constant dense<0.000000e+00> : vector<64x32xf32>
    %120 = tpu.matmul %119, %118, %cst_61 {dimension_numbers = #tpu.dot_dimension_numbers<[1], [0], [0], [1], [0, 0, 1, 1], [], []>} : vector<64x16xf32>, vector<16x32xf32>, vector<64x32xf32> -> vector<64x32xf32>
    %c0_62 = arith.constant 0 : index
    %c0_63 = arith.constant 0 : index
    %121 = vector.load %arg11[%c0_62, %c0_63] : memref<1x32xf32, #tpu.memory_space<vmem>>, vector<1x32xf32>
    %122 = vector.extract_strided_slice %120 {offsets = [0, 0], sizes = [16, 32], strides = [1, 1]} : vector<64x32xf32> to vector<16x32xf32>
    %c0_64 = arith.constant 0 : index
    %c0_65 = arith.constant 0 : index
    %c0_66 = arith.constant 0 : index
    %123 = vector.load %arg10[%c0_64, %c0_65, %c0_66] : memref<4x32x32xf32, #tpu.memory_space<vmem>>, vector<1x32x32xf32>
    %124 = vector.shape_cast %123 : vector<1x32x32xf32> to vector<32x32xf32>
    %cst_67 = arith.constant dense<0.000000e+00> : vector<16x32xf32>
    %125 = tpu.matmul %122, %124, %cst_67 {dimension_numbers = #tpu.dot_dimension_numbers<[1], [0], [0], [1], [0, 0, 1, 1], [], []>} : vector<16x32xf32>, vector<32x32xf32>, vector<16x32xf32> -> vector<16x32xf32>
    %126 = vector.broadcast %121 : vector<1x32xf32> to vector<16x32xf32>
    %127 = arith.addf %126, %125 : vector<16x32xf32>
    %128 = vector.extract_strided_slice %120 {offsets = [16, 0], sizes = [16, 32], strides = [1, 1]} : vector<64x32xf32> to vector<16x32xf32>
    %c1_68 = arith.constant 1 : index
    %c0_69 = arith.constant 0 : index
    %c0_70 = arith.constant 0 : index
    %129 = vector.load %arg10[%c1_68, %c0_69, %c0_70] : memref<4x32x32xf32, #tpu.memory_space<vmem>>, vector<1x32x32xf32>
    %130 = vector.shape_cast %129 : vector<1x32x32xf32> to vector<32x32xf32>
    %cst_71 = arith.constant dense<0.000000e+00> : vector<16x32xf32>
    %131 = tpu.matmul %128, %130, %cst_71 {dimension_numbers = #tpu.dot_dimension_numbers<[1], [0], [0], [1], [0, 0, 1, 1], [], []>} : vector<16x32xf32>, vector<32x32xf32>, vector<16x32xf32> -> vector<16x32xf32>
    %132 = arith.addf %127, %131 : vector<16x32xf32>
    %133 = vector.extract_strided_slice %120 {offsets = [32, 0], sizes = [16, 32], strides = [1, 1]} : vector<64x32xf32> to vector<16x32xf32>
    %c2_72 = arith.constant 2 : index
    %c0_73 = arith.constant 0 : index
    %c0_74 = arith.constant 0 : index
    %134 = vector.load %arg10[%c2_72, %c0_73, %c0_74] : memref<4x32x32xf32, #tpu.memory_space<vmem>>, vector<1x32x32xf32>
    %135 = vector.shape_cast %134 : vector<1x32x32xf32> to vector<32x32xf32>
    %cst_75 = arith.constant dense<0.000000e+00> : vector<16x32xf32>
    %136 = tpu.matmul %133, %135, %cst_75 {dimension_numbers = #tpu.dot_dimension_numbers<[1], [0], [0], [1], [0, 0, 1, 1], [], []>} : vector<16x32xf32>, vector<32x32xf32>, vector<16x32xf32> -> vector<16x32xf32>
    %137 = arith.addf %132, %136 : vector<16x32xf32>
    %138 = vector.extract_strided_slice %120 {offsets = [48, 0], sizes = [16, 32], strides = [1, 1]} : vector<64x32xf32> to vector<16x32xf32>
    %c3_76 = arith.constant 3 : index
    %c0_77 = arith.constant 0 : index
    %c0_78 = arith.constant 0 : index
    %139 = vector.load %arg10[%c3_76, %c0_77, %c0_78] : memref<4x32x32xf32, #tpu.memory_space<vmem>>, vector<1x32x32xf32>
    %140 = vector.shape_cast %139 : vector<1x32x32xf32> to vector<32x32xf32>
    %cst_79 = arith.constant dense<0.000000e+00> : vector<16x32xf32>
    %141 = tpu.matmul %138, %140, %cst_79 {dimension_numbers = #tpu.dot_dimension_numbers<[1], [0], [0], [1], [0, 0, 1, 1], [], []>} : vector<16x32xf32>, vector<32x32xf32>, vector<16x32xf32> -> vector<16x32xf32>
    %142 = arith.addf %137, %141 : vector<16x32xf32>
    %cst_80 = arith.constant 0.000000e+00 : f32
    %143 = vector.broadcast %cst_80 : f32 to vector<16x32xf32>
    %144 = arith.maximumf %142, %143 : vector<16x32xf32>
    %c0_81 = arith.constant 0 : index
    %c0_82 = arith.constant 0 : index
    %145 = vector.load %arg12[%c0_81, %c0_82] : memref<32x32xf32, #tpu.memory_space<vmem>>, vector<32x32xf32>
    %cst_83 = arith.constant dense<0.000000e+00> : vector<16x32xf32>
    %146 = tpu.matmul %144, %145, %cst_83 {dimension_numbers = #tpu.dot_dimension_numbers<[1], [0], [0], [1], [0, 0, 1, 1], [], []>} : vector<16x32xf32>, vector<32x32xf32>, vector<16x32xf32> -> vector<16x32xf32>
    %c0_84 = arith.constant 0 : index
    %c0_85 = arith.constant 0 : index
    %147 = vector.load %arg13[%c0_84, %c0_85] : memref<1x32xf32, #tpu.memory_space<vmem>>, vector<1x32xf32>
    %148 = vector.broadcast %147 : vector<1x32xf32> to vector<16x32xf32>
    %149 = arith.addf %146, %148 : vector<16x32xf32>
    %c0_86 = arith.constant 0 : index
    %c0_87 = arith.constant 0 : index
    %150 = vector.load %arg14[%c0_86, %c0_87] : memref<16x32xf32, #tpu.memory_space<vmem>>, vector<16x32xf32>
    tpu.vector_store %arg14[%c0_86, %c0_87], %149 {strides = array<i32>} : memref<16x32xf32, #tpu.memory_space<vmem>>, vector<16x32xf32>,
    return
  }
}

</mosaic_0001>

<bundles_post_ra>
// kernel: gnngl_forward.1
= control target key start
LH: loop header
LB: loop body
LE: loop exit
PB: predicated region body
PF: predicated region fallthrough
CT: control target
= control target key end

     0   :  { %v48_v0 = vlaneseq  ;;  %v4230_v4 = vmov 0.0   ;;  %s4196_s0 = inlined_call_operand.vmem [shape: f32[1,8], index: 0, kind: input, shape index: {}]   ;;  %s4197_s1 = inlined_call_operand.vmem [shape: f32[16,256], index: 1, kind: input, shape index: {}]   ;;  %s4198_s2 = inlined_call_operand.vmem [shape: f32[16,256], index: 2, kind: input, shape index: {}]   ;;  %s4199_s3 = inlined_call_operand.vmem [shape: f32[32,32], index: 3, kind: input, shape index: {}]   ;;  %s4200_s4 = inlined_call_operand.vmem [shape: f32[1,32], index: 4, kind: input, shape index: {}]   ;;  %s4201_s5 = inlined_call_operand.vmem [shape: f32[32,32], index: 5, kind: input, shape index: {}]   ;;  %s4202_s6 = inlined_call_operand.vmem [shape: f32[1,32], index: 6, kind: input, shape index: {}]   ;;  %s4203_s7 = inlined_call_operand.vmem [shape: f32[64,16], index: 7, kind: input, shape index: {}]   ;;  %s4204_s8 = inlined_call_operand.vmem [shape: f32[4,32,32], index: 8, kind: input, shape index: {}]   ;;  %s4205_s9 = inlined_call_operand.vmem [shape: f32[1,32], index: 9, kind: input, shape index: {}]   ;;  %s4206_s10 = inlined_call_operand.vmem [shape: f32[4,32,32], index: 10, kind: input, shape index: {}]   ;;  %s4207_s11 = inlined_call_operand.vmem [shape: f32[1,32], index: 11, kind: input, shape index: {}]   ;;  %s4208_s12 = inlined_call_operand.vmem [shape: f32[32,32], index: 12, kind: input, shape index: {}]   ;;  %s4209_s13 = inlined_call_operand.vmem [shape: f32[1,32], index: 13, kind: input, shape index: {}]   ;;  %s4210_s14 = inlined_call_operand.hbm [shape: f32[16,32], index: 14, kind: output, shape index: {}]  }
   0x1   :  { %v3281_v1 = vld [vmem:[%s4196_s0] sm:$0x1]  ;;  %v3286_v2 = vld [vmem:[%s4197_s1 + $0x8] sm:$0xff]  ;;  %927 = vmatprep.mubr.f32.mxu1 %v4230_v4 }
   0x2   :  { %4252 = vst [vmem:[#allocation5_spill] sm:$0xff] %v3286_v2  ;;  %v727_v3 = vmul.f32 %v3286_v2, %v3286_v2 }
   0x3   :  { %19 = vsyncpa [#allocation3], 0  ;;  %v3291_v5 = vshrl.u32 %v48_v0, 7  ;;  %v730_v6 = vmul.f32 %v3281_v1, %v3281_v1  ;;  %v3295_v7 = vand.u32 127, %v48_v0  ;;  %v3841_v35 = vld [vmem:[%s4198_s2 + $0x18] sm:$0xff]  ;;  %v3851_v46 = vld [vmem:[%s4198_s2 + $0x10] sm:$0xff] }
   0x4   :  { %833 = vmatprep.mubr.f32.mxu0 %v727_v3  ;;  %v951_v45 = vmul.f32 %v3841_v35, %v3841_v35  ;;  %v950_v61 = vmul.f32 %v3851_v46, %v3851_v46 }
   0x5   :  { %v3298_v8 = vadd.s32 128, %v3291_v5  ;;  %v3301_v9 = vadd.s32 136, %v3291_v5  ;;  %v4219_v10 = vsub.s32 0, %v3291_v5  ;;  %v3305_v11 = vadd.s32 8, %v3291_v5 }
   0x6   :  { %v87_v12 = vand.u32 7, %v3291_v5  ;;  %v3309_v13 = vadd.s32 144, %v3291_v5  ;;  %v3312_v14 = vadd.s32 152, %v3291_v5  ;;  %v3315_v15 = vadd.s32 16, %v3291_v5 }
   0x7   :  { %v199_v16 = vand.u32 7, %v3298_v8  ;;  %v206_v17 = vand.u32 7, %v3301_v9  ;;  %v3321_v18 = vrot.slane %v730_v6, %v4219_v10  ;;  %v94_v19 = vand.u32 7, %v3305_v11 }
   0x8   :  { %vm3325_vm0 = vcmp.eq.s32.totalorder %v87_v12, %v3295_v7  ;;  %v213_v21 = vand.u32 7, %v3309_v13  ;;  %v220_v22 = vand.u32 7, %v3312_v14  ;;  %v3332_v23 = vadd.s32 24, %v3291_v5 }
   0x9   :  { %vm3335_vm1 = vcmp.eq.s32.totalorder %v199_v16, %v3295_v7  ;;  %vm3340_vm2 = vcmp.eq.s32.totalorder %v206_v17, %v3295_v7  ;;  %vm3345_vm3 = vcmp.eq.s32.totalorder %v94_v19, %v3295_v7  ;;  %v499_v27 = vsel %vm3325_vm0, 1.0, %v4230_v4 }
   0xa   :  { %v515_v28 = vsel %vm3335_vm1, 1.0, %v4230_v4  ;;  %v516_v29 = vsel %vm3340_vm2, 1.0, %v4230_v4  ;;  %v500_v30 = vsel %vm3345_vm3, 1.0, %v4230_v4  ;;  %v737_v31 = vmul.f32 %v3321_v18, %v499_v27 }
   0xb   :  { %v753_v32 = vmul.f32 %v3321_v18, %v515_v28  ;;  %v754_v33 = vmul.f32 %v3321_v18, %v516_v29  ;;  %v738_v34 = vmul.f32 %v3321_v18, %v500_v30  ;;  %vm3366_vm4 = vcmp.eq.s32.totalorder %v213_v21, %v3295_v7 }
   0xc   :  { %vm3371_vm5 = vcmp.eq.s32.totalorder %v220_v22, %v3295_v7  ;;  %v517_v37 = vsel %vm3366_vm4, 1.0, %v4230_v4  ;;  %v101_v38 = vand.u32 7, %v3315_v15  ;;  %v108_v39 = vand.u32 7, %v3332_v23 }
   0xd   :  { %v2949_v40 = vpack.c.bf16 %v754_v33, %v753_v32  ;;  %v2951_v41 = vpack.c.bf16 %v738_v34, %v737_v31  ;;  %v518_v42 = vsel %vm3371_vm5, 1.0, %v4230_v4  ;;  %v755_v43 = vmul.f32 %v3321_v18, %v517_v37 }
   0xe   :  { %v756_v44 = vmul.f32 %v3321_v18, %v518_v42  ;;  %vm3386_vm6 = vcmp.eq.s32.totalorder %v101_v38, %v3295_v7  ;;  %vm3391_vm7 = vcmp.eq.s32.totalorder %v108_v39, %v3295_v7  ;;  %v3396_v47 = vadd.s32 160, %v3291_v5 }
   0xf   :  { %2950 = vmatprep.subr.bf16.mxu0 %v2949_v40  ;;  %v501_v48 = vsel %vm3386_vm6, 1.0, %v4230_v4  ;;  %v502_v49 = vsel %vm3391_vm7, 1.0, %v4230_v4  ;;  %v3405_v50 = vadd.s32 168, %v3291_v5  ;;  %v3408_v51 = vadd.s32 32, %v3291_v5 }
  0x10   :  { %2952 = vmatpush3.bf16.msra.mxu0 %v2951_v41  ;;  %v2953_v52 = vpack.c.bf16 %v756_v44, %v755_v43  ;;  %v739_v53 = vmul.f32 %v3321_v18, %v501_v48  ;;  %v740_v54 = vmul.f32 %v3321_v18, %v502_v49  ;;  %v227_v55 = vand.u32 7, %v3396_v47 }
  0x11   :  { %v234_v56 = vand.u32 7, %v3405_v50  ;;  %v3415_v57 = vadd.s32 40, %v3291_v5  ;;  %v115_v58 = vand.u32 7, %v3408_v51  ;;  %v3419_v59 = vadd.s32 176, %v3291_v5 }
  0x12   :  { %2954 = vmatprep.subr.bf16.mxu0 %v2953_v52  ;;  %v2955_v60 = vpack.c.bf16 %v740_v54, %v739_v53  ;;  %vm3422_vm8 = vcmp.eq.s32.totalorder %v227_v55, %v3295_v7  ;;  %v3427_v62 = vadd.s32 184, %v3291_v5  ;;  %v3430_v63 = vadd.s32 48, %v3291_v5 }
  0x13   :  { %vm3433_vm9 = vcmp.eq.s32.totalorder %v234_v56, %v3295_v7  ;;  %v519_v3 = vsel %vm3422_vm8, 1.0, %v4230_v4  ;;  %v122_v6 = vand.u32 7, %v3415_v57  ;;  %vm3442_vm10 = vcmp.eq.s32.totalorder %v115_v58, %v3295_v7 }
  0x14   :  { %2956 = vmatpush3.bf16.msra.mxu0 %v2955_v60  ;;  %v520_v16 = vsel %vm3433_vm9, 1.0, %v4230_v4  ;;  %v757_v17 = vmul.f32 %v3321_v18, %v519_v3  ;;  %v503_v19 = vsel %vm3442_vm10, 1.0, %v4230_v4  ;;  %v241_v21 = vand.u32 7, %v3419_v59 }
  0x15   :  { %v758_v22 = vmul.f32 %v3321_v18, %v520_v16  ;;  %vm3456_vm11 = vcmp.eq.s32.totalorder %v122_v6, %v3295_v7  ;;  %v741_v28 = vmul.f32 %v3321_v18, %v503_v19  ;;  %v248_v29 = vand.u32 7, %v3427_v62 }
  0x16   :  { %v504_v30 = vsel %vm3456_vm11, 1.0, %v4230_v4  ;;  %vm3466_vm12 = vcmp.eq.s32.totalorder %v241_v21, %v3295_v7  ;;  %v4277_v31 = vmov 0  ;;  %v3471_v32 = vadd.s32 56, %v3291_v5 }
  0x17   :  { %v4278_v31 = vsel %vm3466_vm12, 4294967295, %v4277_v31  ;;  %v129_v33 = vand.u32 7, %v3430_v63  ;;  %v2957_v34 = vpack.c.bf16 %v758_v22, %v757_v17  ;;  %v742_v37 = vmul.f32 %v3321_v18, %v504_v30 }
  0x18   :  { %vm3476_vm13 = vcmp.eq.s32.totalorder %v248_v29, %v3295_v7  ;;  %v4279_v38 = vmov 0  ;;  %v521_v39 = vsel %vm3466_vm12, 1.0, %v4230_v4  ;;  %v136_v42 = vand.u32 7, %v3471_v32 }
  0x19   :  { %v4280_v38 = vsel %vm3476_vm13, 4294967295, %v4279_v38  ;;  %v522_v40 = vsel %vm3476_vm13, 1.0, %v4230_v4  ;;  %v759_v41 = vmul.f32 %v3321_v18, %v521_v39  ;;  %vm3489_vm14 = vcmp.eq.s32.totalorder %v129_v33, %v3295_v7  ;;  %2958 = vmatprep.subr.bf16.mxu0 %v2957_v34 }
  0x1a   :  { %v4281_v43 = vmov 0  ;;  %v2959_v44 = vpack.c.bf16 %v742_v37, %v741_v28  ;;  %v760_v48 = vmul.f32 %v3321_v18, %v522_v40  ;;  %v505_v49 = vsel %vm3489_vm14, 1.0, %v4230_v4 }
  0x1b   :  { %v4282_v43 = vsel %vm3489_vm14, 4294967295, %v4281_v43  ;;  %v3498_v52 = vadd.s32 192, %v3291_v5  ;;  %vm3501_vm15 = vcmp.eq.s32.totalorder %v136_v42, %v3295_v7  ;;  %v4284_v53 = vmov 0 }
  0x1c   :  { %v4285_v53 = vsel %vm3501_vm15, 4294967295, %v4284_v53  ;;  %v743_v54 = vmul.f32 %v3321_v18, %v505_v49  ;;  %v3507_v55 = vadd.s32 200, %v3291_v5  ;;  %v3510_v56 = vadd.s32 64, %v3291_v5  ;;  %2960 = vmatpush3.bf16.msra.mxu0 %v2959_v44 }
  0x1d   :  { %4283 = vst [vmem:[#allocation6_spill] sm:$0xff] %v3498_v52  ;;  %v2961_v58 = vpack.c.bf16 %v760_v48, %v759_v41  ;;  %v506_v60 = vsel %vm3501_vm15, 1.0, %v4230_v4  ;;  %v255_v3 = vand.u32 7, %v3498_v52  ;;  %v3517_v6 = vadd.s32 72, %v3291_v5 }
  0x1e   :  { %4286 = vst [vmem:[#allocation7_spill] sm:$0xff] %v3507_v55  ;;  %4287 = vst [vmem:[#allocation8_spill] sm:$0xff] %v3510_v56  ;;  %v744_v16 = vmul.f32 %v3321_v18, %v506_v60  ;;  %v262_v17 = vand.u32 7, %v3507_v55  ;;  %v143_v19 = vand.u32 7, %v3510_v56  ;;  %v3523_v21 = vadd.s32 208, %v3291_v5 }
  0x1f   :  { %4288 = vst [vmem:[#allocation9_spill] sm:$0xff] %v3517_v6  ;;  %2962 = vmatprep.subr.bf16.mxu0 %v2961_v58  ;;  %vm3526_vm14 = vcmp.eq.s32.totalorder %v255_v3, %v3295_v7  ;;  %v4290_v22 = vmov 0  ;;  %v150_v28 = vand.u32 7, %v3517_v6  ;;  %v3532_v29 = vadd.s32 216, %v3291_v5 }
  0x20   :  { %4289 = vst [vmem:[#allocation10_spill] sm:$0xff] %v3523_v21  ;;  %v4291_v22 = vsel %vm3526_vm14, 4294967295, %v4290_v22  ;;  %v3535_v30 = vadd.s32 80, %v3291_v5  ;;  %v2963_v33 = vpack.c.bf16 %v744_v16, %v743_v54  ;;  %vm3538_vm15 = vcmp.eq.s32.totalorder %v262_v17, %v3295_v7 }
  0x21   :  { %4292 = vst [vmem:[#allocation11_spill] sm:$0xff] %v3532_v29  ;;  %v4294_v34 = vmov 0  ;;  %v523_v37 = vsel %vm3526_vm14, 1.0, %v4230_v4  ;;  %vm3546_vm13 = vcmp.eq.s32.totalorder %v143_v19, %v3295_v7  ;;  %v4296_v39 = vmov 0 }
  0x22   :  { %4293 = vst [vmem:[#allocation12_spill] sm:$0xff] %v3535_v30  ;;  %v4295_v34 = vsel %vm3538_vm15, 4294967295, %v4294_v34  ;;  %v4297_v39 = vsel %vm3546_vm13, 4294967295, %v4296_v39  ;;  %v524_v40 = vsel %vm3538_vm15, 1.0, %v4230_v4  ;;  %v761_v41 = vmul.f32 %v3321_v18, %v523_v37  ;;  %2964 = vmatpush3.bf16.msra.mxu0 %v2963_v33 }
  0x23   :  { %vm3555_vm12 = vcmp.eq.s32.totalorder %v150_v28, %v3295_v7  ;;  %v4298_v42 = vmov 0  ;;  %v507_v44 = vsel %vm3546_vm13, 1.0, %v4230_v4  ;;  %v762_v48 = vmul.f32 %v3321_v18, %v524_v40 }
  0x24   :  { %v4299_v42 = vsel %vm3555_vm12, 4294967295, %v4298_v42  ;;  %v508_v49 = vsel %vm3555_vm12, 1.0, %v4230_v4  ;;  %v745_v54 = vmul.f32 %v3321_v18, %v507_v44  ;;  %v269_v58 = vand.u32 7, %v3523_v21 }
  0x25   :  { %v746_v60 = vmul.f32 %v3321_v18, %v508_v49  ;;  %v276_v3 = vand.u32 7, %v3532_v29  ;;  %v3571_v16 = vadd.s32 88, %v3291_v5  ;;  %v157_v17 = vand.u32 7, %v3535_v30 }
  0x26   :  { %v2965_v19 = vpack.c.bf16 %v762_v48, %v761_v41  ;;  %vm3575_vm13 = vcmp.eq.s32.totalorder %v269_v58, %v3295_v7  ;;  %v4301_v28 = vmov 0  ;;  %v3580_v33 = vadd.s32 224, %v3291_v5 }
  0x27   :  { %4300 = vst [vmem:[#allocation13_spill] sm:$0xff] %v3571_v16  ;;  %v4302_v28 = vsel %vm3575_vm13, 4294967295, %v4301_v28  ;;  %v3583_v37 = vadd.s32 232, %v3291_v5  ;;  %v2967_v40 = vpack.c.bf16 %v746_v60, %v745_v54  ;;  %vm3586_vm12 = vcmp.eq.s32.totalorder %v276_v3, %v3295_v7 }
  0x28   :  { %4303 = vst [vmem:[#allocation14_spill] sm:$0xff] %v3580_v33  ;;  %v4305_v44 = vmov 0  ;;  %v525_v41 = vsel %vm3575_vm13, 1.0, %v4230_v4  ;;  %v164_v48 = vand.u32 7, %v3571_v16  ;;  %2966 = vmatprep.subr.bf16.mxu0 %v2965_v19  ;;  %v526_v49 = vsel %vm3586_vm12, 1.0, %v4230_v4 }
  0x29   :  { %4304 = vst [vmem:[#allocation15_spill] sm:$0xff] %v3583_v37  ;;  %v4306_v44 = vsel %vm3586_vm12, 4294967295, %v4305_v44  ;;  %v763_v58 = vmul.f32 %v3321_v18, %v525_v41  ;;  %vm3599_vm15 = vcmp.eq.s32.totalorder %v157_v17, %v3295_v7  ;;  %v4307_v54 = vmov 0  ;;  %2968 = vmatpush3.bf16.msra.mxu0 %v2967_v40 }
  0x2a   :  { %v4308_v54 = vsel %vm3599_vm15, 4294967295, %v4307_v54  ;;  %v283_v60 = vand.u32 7, %v3580_v33  ;;  %v764_v3 = vmul.f32 %v3321_v18, %v526_v49  ;;  %vm3606_vm13 = vcmp.eq.s32.totalorder %v164_v48, %v3295_v7 }
  0x2b   :  { %v4309_v10 = vmov 0  ;;  %v509_v19 = vsel %vm3599_vm15, 1.0, %v4230_v4  ;;  %v290_v41 = vand.u32 7, %v3583_v37  ;;  %v510_v17 = vsel %vm3606_vm13, 1.0, %v4230_v4 }
  0x2c   :  { %v4310_v10 = vsel %vm3606_vm13, 4294967295, %v4309_v10  ;;  %v747_v2 = vmul.f32 %v3321_v18, %v509_v19  ;;  %vm3619_vm12 = vcmp.eq.s32.totalorder %v283_v60, %v3295_v7  ;;  %v4311_v40 = vmov 0 }
  0x2d   :  { %v4312_v40 = vsel %vm3619_vm12, 4294967295, %v4311_v40  ;;  %v3624_v48 = vadd.s32 96, %v3291_v5  ;;  %v2969_v49 = vpack.c.bf16 %v764_v3, %v763_v58  ;;  %v748_v33 = vmul.f32 %v3321_v18, %v510_v17 }
  0x2e   :  { %vm3628_vm15 = vcmp.eq.s32.totalorder %v290_v41, %v3295_v7  ;;  %v4314_v37 = vmov 0  ;;  %v527_v19 = vsel %vm3619_vm12, 1.0, %v4230_v4  ;;  %v3640_v30 = vadd.s32 104, %v3291_v5 }
  0x2f   :  { %4313 = vst [vmem:[#allocation16_spill] sm:$0xff] %v3624_v48  ;;  %v4315_v37 = vsel %vm3628_vm15, 4294967295, %v4314_v37  ;;  %v528_v60 = vsel %vm3628_vm15, 1.0, %v4230_v4  ;;  %v765_v16 = vmul.f32 %v3321_v18, %v527_v19  ;;  %v171_v58 = vand.u32 7, %v3624_v48  ;;  %2970 = vmatprep.subr.bf16.mxu0 %v2969_v49 }
  0x30   :  { %4316 = vst [vmem:[#allocation17_spill] sm:$0xff] %v3640_v30  ;;  %v2971_v3 = vpack.c.bf16 %v748_v33, %v747_v2  ;;  %v766_v41 = vmul.f32 %v3321_v18, %v528_v60  ;;  %v3645_v17 = vadd.s32 240, %v3291_v5  ;;  %v3648_v29 = vadd.s32 248, %v3291_v5 }
  0x31   :  { %v178_v21 = vand.u32 7, %v3640_v30  ;;  %vm3652_vm15 = vcmp.eq.s32.totalorder %v171_v58, %v3295_v7  ;;  %v4319_v19 = vmov 0  ;;  %v3657_v4 = vadd.s32 112, %v3291_v5 }
  0x32   :  { %4317 = vst [vmem:[#allocation18_spill] sm:$0xff] %v3645_v17  ;;  %4318 = vst [vmem:[#allocation19_spill] sm:$0xff] %v3648_v29  ;;  %v4320_v19 = vsel %vm3652_vm15, 4294967295, %v4319_v19  ;;  %v3660_v2 = vadd.s32 120, %v3291_v5  ;;  %2972 = vmatpush3.bf16.msra.mxu0 %v2971_v3  ;;  %v2973_v33 = vpack.c.bf16 %v766_v41, %v765_v16  ;;  %v4323_v49 = vmov 0.0   ;;  %v4364_v41 = vld [vmem:[#allocation15_spill] sm:$0xff] }
  0x33   :  { %4321 = vst [vmem:[#allocation20_spill] sm:$0xff] %v3657_v4  ;;  %v511_v60 = vsel %vm3652_vm15, 1.0, %v4323_v49  ;;  %v297_v48 = vand.u32 7, %v3645_v17  ;;  %v304_v30 = vand.u32 7, %v3648_v29  ;;  %vm3668_vm12 = vcmp.eq.s32.totalorder %v178_v21, %v3295_v7 }
  0x34   :  { %4322 = vst [vmem:[#allocation21_spill] sm:$0xff] %v3660_v2  ;;  %v4324_v58 = vmov 0  ;;  %v749_v6 = vmul.f32 %v3321_v18, %v511_v60  ;;  %v185_v56 = vand.u32 7, %v3657_v4  ;;  %v192_v3 = vand.u32 7, %v3660_v2  ;;  %2974 = vmatprep.subr.bf16.mxu0 %v2973_v33 }
  0x35   :  { %v4325_v58 = vsel %vm3668_vm12, 4294967295, %v4324_v58  ;;  %v512_v16 = vsel %vm3668_vm12, 1.0, %v4323_v49  ;;  %vm3679_vm15 = vcmp.eq.s32.totalorder %v297_v48, %v3295_v7  ;;  %vm3684_vm13 = vcmp.eq.s32.totalorder %v304_v30, %v3295_v7 }
  0x36   :  { %v4328_v21 = vmov 0  ;;  %v750_v60 = vmul.f32 %v3321_v18, %v512_v16  ;;  %v529_v33 = vsel %vm3679_vm15, 1.0, %v4323_v49  ;;  %v530_v2 = vsel %vm3684_vm13, 1.0, %v4323_v49 }
  0x37   :  { %v4329_v21 = vsel %vm3684_vm13, 4294967295, %v4328_v21  ;;  %vm3696_vm12 = vcmp.eq.s32.totalorder %v185_v56, %v3295_v7  ;;  %v4330_v48 = vmov 0  ;;  %v767_v30 = vmul.f32 %v3321_v18, %v529_v33  ;;  %vm2981_vm13 = vmpackc.low %vm3340_vm2, %vm3335_vm1 }
  0x38   :  { %v4331_v48 = vsel %vm3696_vm12, 4294967295, %v4330_v48  ;;  %v768_v4 = vmul.f32 %v3321_v18, %v530_v2  ;;  %vm3703_vm14 = vcmp.eq.s32.totalorder %v192_v3, %v3295_v7  ;;  %v4332_v16 = vmov 0  ;;  %v3718_v2 = vld [vmem:[%s4197_s1] sm:$0xff]  ;;  %vm2983_vm2 = vmpackc.low %vm3345_vm3, %vm3325_vm0 }
  0x39   :  { %v4333_v16 = vsel %vm3703_vm14, 4294967295, %v4332_v16  ;;  %v513_v29 = vsel %vm3696_vm12, 1.0, %v4323_v49  ;;  %v2975_v17 = vpack.c.bf16 %v750_v60, %v749_v6  ;;  %v514_v56 = vsel %vm3703_vm14, 1.0, %v4323_v49  ;;  %v3723_v6 = vld [vmem:[%s4197_s1 + $0x18] sm:$0xff]  ;;  %vm2987_vm0 = vmpackc.low %vm3391_vm7, %vm3386_vm6 }
  0x3a   :  { %v751_v55 = vmul.f32 %v3321_v18, %v513_v29  ;;  %v2977_v52 = vpack.c.bf16 %v768_v4, %v767_v30  ;;  %v752_v33 = vmul.f32 %v3321_v18, %v514_v56  ;;  %4334 = vst [vmem:[#allocation22_spill] sm:$0xff] %v3723_v6  ;;  %v726_v60 = vmul.f32 %v3718_v2, %v3718_v2  ;;  %v3732_v18 = vld [vmem:[%s4197_s1 + $0x10] sm:$0xff]  ;;  %vm2989_vm3 = vmpackc.low %vm3433_vm9, %vm3422_vm8 }
  0x3b   :  { %2976 = vmatpush3.bf16.msra.mxu0 %v2975_v17  ;;  %v729_v4 = vmul.f32 %v3723_v6, %v3723_v6  ;;  %v536_v29 = vand.u32 7, %v3295_v7  ;;  %v3198_v30 = vmov 1.0   ;;  %v3199_v56 = vmov 1.0|1.0  }
  0x3c   :  { %2978 = vmatprep.subr.bf16.mxu0 %v2977_v52  ;;  %v2979_v3 = vpack.c.bf16 %v752_v33, %v751_v55  ;;  %v728_v52 = vmul.f32 %v3732_v18, %v3732_v18  ;;  %v531_v55 = vadd.s32 128, %v3295_v7  ;;  %v4335_v25 = vsub.s32 0, %v3291_v5 }
  0x3d   :  { %vm556_vm14 = vcmp.eq.s32.totalorder %v536_v29, %v3291_v5  ;;  %vm4251_vm1 = vcmask 64512   ;;  %vm4337_vm6 = vnez %v4280_v38  ;;  %vm4338_vm8 = vnez %v4282_v43 }
  0x3e   :  { %v543_v17 = vand.u32 7, %v531_v55  ;;  %vm4339_vm9 = vnez %v4285_v53  ;;  %v3856_v0 = vmul.u32 8, %v3295_v7  ;;  %v4358_v53 = vld [vmem:[#allocation9_spill] sm:$0xff] }
  0x3f   :  { %2980 = vmatpush3.bf16.msra.mxu0 %v2979_v3 }
  0x40   :  { %vm557_vm12 = vcmp.eq.s32.totalorder %v543_v17, %v3291_v5  ;;  %v852_v17 = vrot.slane %v3281_v1, %v4335_v25  ;;  %v577_v12 = vsub.s32 %v3298_v8, %v3856_v0  ;;  %v578_v27 = vsub.s32 %v3301_v9, %v3856_v0 }
  0x41   :  { %2457 = vmatprep.subr.msk.mxu1 %vm557_vm12, %v3198_v30  ;;  %2493 = vmatprep.subr.msk.mxu0 %vm557_vm12, %v3198_v30  ;;  %vm2985_vm12 = vmpackc.low %vm3371_vm5, %vm3366_vm4  ;;  %vm4336_vm5 = vnez %v4278_v31  ;;  %v561_v31 = vsub.s32 %v3291_v5, %v3856_v0  ;;  %v562_v38 = vsub.s32 %v3305_v11, %v3856_v0  ;;  %v579_v43 = vsub.s32 %v3309_v13, %v3856_v0 }
  0x42   :  { %834 = vmatmul.mubr.f32.vlgmr.msra.gmra.mrb[0].mxu0 %v726_v60  ;;  %2458 = vmatpush1.msk.msra.mxu1 %vm556_vm14, %v3198_v30  ;;  %vm2991_vm4 = vmpackc.low %vm3456_vm11, %vm3442_vm10  ;;  %vm4342_vm10 = vnez %v4297_v39  ;;  %vm4343_vm11 = vnez %v4299_v42  ;;  %v580_v7 = vsub.s32 %v3312_v14, %v3856_v0  ;;  %v563_v5 = vsub.s32 %v3315_v15, %v3856_v0  ;;  %v4360_v42 = vld [vmem:[#allocation11_spill] sm:$0xff] }
  0x43   :  { %838 = vmatprep.mubr.f32.mxu0 %v729_v4  ;;  %2494 = vmatpush1.msk.msra.mxu0 %vm556_vm14, %v3198_v30  ;;  %vm2993_vm7 = vmpackc.low %vm4337_vm6, %vm4336_vm5  ;;  %vm4340_vm14 = vnez %v4291_v22  ;;  %vm4346_vm6 = vnez %v4308_v54  ;;  %v564_v8 = vsub.s32 %v3332_v23, %v3856_v0  ;;  %v581_v9 = vsub.s32 %v3396_v47, %v3856_v0  ;;  %v4362_v54 = vld [vmem:[#allocation13_spill] sm:$0xff] }
  0x44   :  { %2982 = vmatprep.subr.msk.bf16.mxu1 %vm2981_vm13, %v3199_v56  ;;  %vm2995_vm13 = vmpackc.low %vm4339_vm9, %vm4338_vm8  ;;  %vm4348_vm9 = vnez %v4312_v40  ;;  %v582_v11 = vsub.s32 %v3405_v50, %v3856_v0  ;;  %v565_v13 = vsub.s32 %v3408_v51, %v3856_v0  ;;  %v566_v14 = vsub.s32 %v3415_v57, %v3856_v0  ;;  %v4355_v51 = vld [vmem:[#allocation6_spill] sm:$0xff] }
  0x45   :  { %v583_v15 = vsub.s32 %v3419_v59, %v3856_v0  ;;  %v584_v23 = vsub.s32 %v3427_v62, %v3856_v0  ;;  %v567_v47 = vsub.s32 %v3430_v63, %v3856_v0  ;;  %v568_v50 = vsub.s32 %v3471_v32, %v3856_v0  ;;  %v4356_v59 = vld [vmem:[#allocation7_spill] sm:$0xff]  ;;  %v4357_v63 = vld [vmem:[#allocation8_spill] sm:$0xff] }
  0x46   :  { %839 = vmatmul.mubr.f32.gmra.mrb[2].mxu0 %v728_v52  ;;  %v585_v57 = vsub.s32 %v4355_v51, %v3856_v0  ;;  %v586_v62 = vsub.s32 %v4356_v59, %v3856_v0  ;;  %v569_v32 = vsub.s32 %v4357_v63, %v3856_v0  ;;  %v570_v22 = vsub.s32 %v4358_v53, %v3856_v0  ;;  %v4374_v59 = vld [vmem:[#allocation22_spill] sm:$0xff]  ;;  %v1292_v53 = vld [vmem:[%s4201_s5] sm:$0xff] }
  0x47   :  { %1101 = vmatprep.mubr.f32.mxu0 %v4323_v49  ;;  %v572_v40 = vsub.s32 %v4362_v54, %v3856_v0  ;;  %v1200_v63 = vld [vmem:[%s4199_s3 + $0x18] sm:$0xff] }
 0x115   :  { %v2628_v33 = vpop.f32.mrb[0].mxu0 }
 0x116   :  { %v2629_v3 = vpop.f32.mrb[1].mxu0 }
 0x117   :  { %v2630_v60 = vadd.f32 %v2629_v3, %v2628_v33  ;;  %v3756_v33 = vld [vmem:[%s4198_s2 + $0x8] sm:$0xff] }
 0x118   :  { %v949_v20 = vmul.f32 %v3756_v33, %v3756_v33 }
 0x119   :  { %v844_v4 = vmax.f32 %v2630_v60, 1e-24  ;;  %v2631_v52 = vpop.f32.mrb[2].mxu0 }
 0x11a   :  { %v2632_v55 = vpop.f32.mrb[3].mxu0 }
 0x11b   :  { %3165 = vrsqrt.f32 %v844_v4  ;;  %v2633_v29 = vadd.f32 %v2632_v55, %v2631_v52 }
 0x11d   :  { %v845_v24 = vmax.f32 %v2633_v29, 1e-24 }
 0x11f   :  { %3167 = vrsqrt.f32 %v845_v24 }
 0x125   :  { %v3166_v6 = vpop.eup %3165 }
 0x126   :  { %v854_v30 = vmul.f32 %v3166_v6, %v852_v17 }
 0x128   :  { %2459 = vmatmul.mubr.msk.f32.vlgmr.msra.gmra.mrb[0].mxu1 %vm4251_vm1, %v854_v30 }
 0x129   :  { %v3168_v1 = vpop.eup %3167  ;;  %2984 = vmatpush3.bf16.msk.msra.mxu1 %vm2983_vm2, %v3199_v56  ;;  %933 = vmatprep.mubr.f32.mxu1 %v4323_v49  ;;  %vm4341_vm2 = vnez %v4295_v34  ;;  %v4359_v34 = vld [vmem:[#allocation10_spill] sm:$0xff] }
 0x12a   :  { %2986 = vmatprep.subr.msk.bf16.mxu1 %vm2985_vm12, %v3199_v56  ;;  %v855_v26 = vmul.f32 %v3168_v1, %v852_v17  ;;  %vm2997_vm12 = vmpackc.low %vm4341_vm2, %vm4340_vm14  ;;  %vm4350_vm2 = vnez %v4320_v19  ;;  %v587_v39 = vsub.s32 %v4359_v34, %v3856_v0  ;;  %v4363_v19 = vld [vmem:[#allocation14_spill] sm:$0xff] }
 0x12c   :  { %2460 = vmatmul.mubr.msk.f32.gmra.mrb[2].mxu1 %vm4251_vm1, %v855_v26 }
 0x12d   :  { %2988 = vmatpush3.bf16.msk.msra.mxu1 %vm2987_vm0, %v3199_v56  ;;  %1016 = vmatprep.mubr.f32.mxu1 %v949_v20  ;;  %vm2999_vm0 = vmpackc.low %vm4343_vm11, %vm4342_vm10  ;;  %vm4352_vm11 = vnez %v4329_v21  ;;  %v590_v21 = vsub.s32 %v4364_v41, %v3856_v0  ;;  %v4367_v20 = vld [vmem:[#allocation16_spill] sm:$0xff]  ;;  %v2529_v41 = vld [vmem:[%s4200_s4] ss:$0 sm:$0xff] }
 0x12e   :  { %2990 = vmatprep.subr.msk.bf16.mxu1 %vm2989_vm3, %v3199_v56  ;;  %vm4344_vm3 = vnez %v4302_v28  ;;  %v588_v28 = vsub.s32 %v4360_v42, %v3856_v0  ;;  %v573_v26 = vsub.s32 %v4367_v20, %v3856_v0 }
 0x131   :  { %2992 = vmatpush3.bf16.msk.msra.mxu1 %vm2991_vm4, %v3199_v56  ;;  %vm4345_vm4 = vnez %v4306_v44 }
 0x132   :  { %2994 = vmatprep.subr.msk.bf16.mxu1 %vm2993_vm7, %v3199_v56  ;;  %vm3001_vm5 = vmpackc.low %vm4345_vm4, %vm4344_vm3  ;;  %vm4347_vm7 = vnez %v4310_v10  ;;  %v3831_v10 = vld [vmem:[%s4198_s2] sm:$0xff]  ;;  %vm4353_vm3 = vnez %v4331_v48  ;;  %vm4354_vm4 = vnez %v4333_v16 }
 0x133   :  { %vm3003_vm8 = vmpackc.low %vm4347_vm7, %vm4346_vm6  ;;  %v948_v36 = vmul.f32 %v3831_v10, %v3831_v10  ;;  %vm610_vm6 = vcmp.ge.s32.totalorder %v578_v27, 0  ;;  %vm641_vm7 = vcmp.lt.s32.totalorder %v577_v12, 8 }
 0x135   :  { %2996 = vmatpush3.bf16.msk.msra.mxu1 %vm2995_vm13, %v3199_v56  ;;  %vm4349_vm13 = vnez %v4315_v37  ;;  %v4361_v37 = vld [vmem:[#allocation12_spill] sm:$0xff] }
 0x136   :  { %2998 = vmatprep.subr.msk.bf16.mxu1 %vm2997_vm12, %v3199_v56  ;;  %vm3005_vm14 = vmpackc.low %vm4349_vm13, %vm4348_vm9  ;;  %vm4351_vm12 = vnez %v4325_v58  ;;  %vm593_vm13 = vcmp.ge.s32.totalorder %v561_v31, 0  ;;  %v571_v44 = vsub.s32 %v4361_v37, %v3856_v0  ;;  %v589_v58 = vsub.s32 %v4363_v19, %v3856_v0  ;;  %v1295_v19 = vld [vmem:[%s4201_s5 + $0x18] sm:$0xff] }
 0x137   :  { %vm3007_vm10 = vmpackc.low %vm4351_vm12, %vm4350_vm2  ;;  %vm594_vm12 = vcmp.ge.s32.totalorder %v562_v38, 0 }
 0x139   :  { %3000 = vmatpush3.bf16.msk.msra.mxu1 %vm2999_vm0, %v3199_v56  ;;  %vm3009_vm0 = vmpackc.low %vm4352_vm11, %vm3679_vm15  ;;  %vm609_vm15 = vcmp.ge.s32.totalorder %v577_v12, 0 }
 0x13a   :  { %3002 = vmatprep.subr.msk.bf16.mxu1 %vm3001_vm5, %v3199_v56  ;;  %vm3011_vm5 = vmpackc.low %vm4354_vm4, %vm4353_vm3  ;;  %vm611_vm3 = vcmp.ge.s32.totalorder %v579_v43, 0  ;;  %vm643_vm4 = vcmp.lt.s32.totalorder %v579_v43, 8  ;;  %v4372_v43 = vld [vmem:[#allocation21_spill] sm:$0xff] }
 0x13b   :  { %vm673_vm9 = vmand %vm609_vm15, %vm641_vm7  ;;  %vm612_vm15 = vcmp.ge.s32.totalorder %v580_v7, 0  ;;  %vm644_vm7 = vcmp.lt.s32.totalorder %v580_v7, 8  ;;  %v576_v7 = vsub.s32 %v4372_v43, %v3856_v0  ;;  %v4041_v43 = vld [vmem:[%s4203_s7 + $0x38] sm:$0xff] }
 0x13d   :  { %3004 = vmatpush3.bf16.msk.msra.mxu1 %vm3003_vm8, %v3199_v56  ;;  %vm642_vm8 = vcmp.lt.s32.totalorder %v578_v27, 8  ;;  %v4370_v27 = vld [vmem:[#allocation19_spill] sm:$0xff] }
 0x13e   :  { %3006 = vmatprep.subr.msk.bf16.mxu1 %vm3005_vm14, %v3199_v56  ;;  %vm625_vm14 = vcmp.lt.s32.totalorder %v561_v31, 8  ;;  %vm674_vm2 = vmand %vm610_vm6, %vm642_vm8  ;;  %vm595_vm8 = vcmp.ge.s32.totalorder %v563_v5, 0  ;;  %v4371_v31 = vld [vmem:[#allocation20_spill] sm:$0xff] }
 0x13f   :  { %vm3013_vm11 = vmpackc.low %vm674_vm2, %vm673_vm9  ;;  %vm627_vm9 = vcmp.lt.s32.totalorder %v563_v5, 8  ;;  %vm628_vm2 = vcmp.lt.s32.totalorder %v564_v8, 8 }
 0x140   :  { %vm675_vm6 = vmand %vm611_vm3, %vm643_vm4  ;;  %vm614_vm3 = vcmp.ge.s32.totalorder %v582_v11, 0  ;;  %vm646_vm4 = vcmp.lt.s32.totalorder %v582_v11, 8  ;;  %v4373_v11 = vld [vmem:[#allocation5_spill] sm:$0xff] }
 0x141   :  { %3008 = vmatpush3.bf16.msk.msra.mxu1 %vm3007_vm10, %v3199_v56  ;;  %vm626_vm10 = vcmp.lt.s32.totalorder %v562_v38, 8  ;;  %v575_v38 = vsub.s32 %v4371_v31, %v3856_v0  ;;  %v4027_v31 = vld [vmem:[%s4203_s7 + $0x28] sm:$0xff] }
 0x142   :  { %3010 = vmatprep.subr.msk.bf16.mxu1 %vm3009_vm0, %v3199_v56  ;;  %vm657_vm0 = vmand %vm593_vm13, %vm625_vm14  ;;  %vm596_vm14 = vcmp.ge.s32.totalorder %v564_v8, 0 }
 0x143   :  { %vm676_vm13 = vmand %vm612_vm15, %vm644_vm7  ;;  %vm597_vm7 = vcmp.ge.s32.totalorder %v565_v13, 0 }
 0x145   :  { %3012 = vmatpush3.bf16.msk.msra.mxu1 %vm3011_vm5, %v3199_v56  ;;  %vm658_vm5 = vmand %vm594_vm12, %vm626_vm10  ;;  %vm613_vm10 = vcmp.ge.s32.totalorder %v581_v9, 0 }
 0x146   :  { %3014 = vmatprep.subr.msk.bf16.mxu1 %vm3013_vm11, %v3199_v56  ;;  %vm3015_vm1 = vmpackc.low %vm658_vm5, %vm657_vm0  ;;  %vm645_vm0 = vcmp.lt.s32.totalorder %v581_v9, 8 }
 0x147   :  { %vm3017_vm11 = vmpackc.low %vm676_vm13, %vm675_vm6  ;;  %vm629_vm6 = vcmp.lt.s32.totalorder %v565_v13, 8  ;;  %vm630_vm13 = vcmp.lt.s32.totalorder %v566_v14, 8 }
 0x148   :  { %1017 = vmatmul.mubr.f32.vlgmr.msra.gmra.mrb[4].mxu1 %v948_v36  ;;  %vm659_vm12 = vmand %vm595_vm8, %vm627_vm9  ;;  %vm598_vm9 = vcmp.ge.s32.totalorder %v566_v14, 0  ;;  %v4368_v36 = vld [vmem:[#allocation17_spill] sm:$0xff] }
 0x149   :  { %1021 = vmatprep.mubr.f32.mxu1 %v951_v45  ;;  %3016 = vmatpush3.bf16.msk.msra.mxu1 %vm3015_vm1, %v3199_v56  ;;  %vm660_vm1 = vmand %vm596_vm14, %vm628_vm2  ;;  %vm615_vm2 = vcmp.ge.s32.totalorder %v583_v15, 0  ;;  %v574_v45 = vsub.s32 %v4368_v36, %v3856_v0 }
 0x14a   :  { %3018 = vmatprep.subr.msk.bf16.mxu1 %vm3017_vm11, %v3199_v56  ;;  %vm3019_vm5 = vmpackc.low %vm660_vm1, %vm659_vm12  ;;  %vm647_vm12 = vcmp.lt.s32.totalorder %v583_v15, 8  ;;  %vm648_vm1 = vcmp.lt.s32.totalorder %v584_v23, 8 }
 0x14b   :  { %vm677_vm15 = vmand %vm613_vm10, %vm645_vm0  ;;  %vm616_vm0 = vcmp.ge.s32.totalorder %v584_v23, 0 }
 0x14c   :  { %1022 = vmatmul.mubr.f32.gmra.mrb[6].mxu1 %v950_v61  ;;  %vm678_vm8 = vmand %vm614_vm3, %vm646_vm4  ;;  %vm599_vm4 = vcmp.ge.s32.totalorder %v567_v47, 0  ;;  %v4369_v61 = vld [vmem:[#allocation18_spill] sm:$0xff] }
 0x14d   :  { %3020 = vmatpush3.bf16.msk.msra.mxu1 %vm3019_vm5, %v3199_v56  ;;  %vm3021_vm11 = vmpackc.low %vm678_vm8, %vm677_vm15  ;;  %vm631_vm15 = vcmp.lt.s32.totalorder %v567_v47, 8  ;;  %vm632_vm8 = vcmp.lt.s32.totalorder %v568_v50, 8  ;;  %v591_v12 = vsub.s32 %v4369_v61, %v3856_v0  ;;  %v4002_v61 = vld [vmem:[%s4203_s7 + $0x8] sm:$0xff] }
 0x14e   :  { %3022 = vmatprep.subr.msk.bf16.mxu1 %vm3021_vm11, %v3199_v56  ;;  %vm661_vm14 = vmand %vm597_vm7, %vm629_vm6  ;;  %vm600_vm6 = vcmp.ge.s32.totalorder %v568_v50, 0 }
 0x14f   :  { %vm662_vm10 = vmand %vm598_vm9, %vm630_vm13  ;;  %vm617_vm13 = vcmp.ge.s32.totalorder %v585_v57, 0 }
 0x150   :  { %vm3023_vm5 = vmpackc.low %vm662_vm10, %vm661_vm14  ;;  %vm649_vm14 = vcmp.lt.s32.totalorder %v585_v57, 8  ;;  %vm650_vm10 = vcmp.lt.s32.totalorder %v586_v62, 8 }
 0x151   :  { %3024 = vmatpush3.bf16.msk.msra.mxu1 %vm3023_vm5, %v3199_v56  ;;  %vm679_vm3 = vmand %vm615_vm2, %vm647_vm12  ;;  %vm618_vm12 = vcmp.ge.s32.totalorder %v586_v62, 0 }
 0x152   :  { %vm680_vm7 = vmand %vm616_vm0, %vm648_vm1  ;;  %vm601_vm1 = vcmp.ge.s32.totalorder %v569_v32, 0 }
 0x153   :  { %vm3025_vm11 = vmpackc.low %vm680_vm7, %vm679_vm3  ;;  %vm633_vm3 = vcmp.lt.s32.totalorder %v569_v32, 8  ;;  %vm634_vm7 = vcmp.lt.s32.totalorder %v570_v22, 8 }
 0x154   :  { %3026 = vmatprep.subr.msk.bf16.mxu1 %vm3025_vm11, %v3199_v56  ;;  %vm663_vm9 = vmand %vm599_vm4, %vm631_vm15  ;;  %vm602_vm15 = vcmp.ge.s32.totalorder %v570_v22, 0  ;;  %v1293_v22 = vld [vmem:[%s4201_s5 + $0x8] sm:$0xff] }
 0x155   :  { %vm664_vm2 = vmand %vm600_vm6, %vm632_vm8  ;;  %vm619_vm8 = vcmp.ge.s32.totalorder %v587_v39, 0  ;;  %v3053_v34 = vpack.c.bf16 %v1293_v22, %v1292_v53  ;;  %v2545_v22 = vld [vmem:[%s4205_s9] ss:$0 sm:$0xff] }
 0x156   :  { %vm3027_vm5 = vmpackc.low %vm664_vm2, %vm663_vm9  ;;  %vm651_vm9 = vcmp.lt.s32.totalorder %v587_v39, 8  ;;  %vm652_vm2 = vcmp.lt.s32.totalorder %v588_v28, 8 }
 0x157   :  { %3028 = vmatpush3.bf16.msk.msra.mxu1 %vm3027_vm5, %v3199_v56  ;;  %vm681_vm0 = vmand %vm617_vm13, %vm649_vm14  ;;  %vm620_vm14 = vcmp.ge.s32.totalorder %v588_v28, 0 }
 0x158   :  { %vm682_vm4 = vmand %vm618_vm12, %vm650_vm10  ;;  %vm603_vm10 = vcmp.ge.s32.totalorder %v571_v44, 0 }
 0x159   :  { %vm3029_vm11 = vmpackc.low %vm682_vm4, %vm681_vm0  ;;  %vm635_vm0 = vcmp.lt.s32.totalorder %v571_v44, 8  ;;  %vm636_vm4 = vcmp.lt.s32.totalorder %v572_v40, 8 }
 0x15a   :  { %3030 = vmatprep.subr.msk.bf16.mxu1 %vm3029_vm11, %v3199_v56  ;;  %vm665_vm6 = vmand %vm601_vm1, %vm633_vm3  ;;  %vm604_vm3 = vcmp.ge.s32.totalorder %v572_v40, 0  ;;  %v1294_v40 = vld [vmem:[%s4201_s5 + $0x10] sm:$0xff] }
 0x15b   :  { %vm666_vm13 = vmand %vm602_vm15, %vm634_vm7  ;;  %vm621_vm7 = vcmp.ge.s32.totalorder %v589_v58, 0 }
 0x15c   :  { %vm3031_vm5 = vmpackc.low %vm666_vm13, %vm665_vm6  ;;  %vm653_vm6 = vcmp.lt.s32.totalorder %v589_v58, 8  ;;  %v3057_v58 = vpack.c.bf16 %v1295_v19, %v1294_v40 }
 0x15d   :  { %3032 = vmatpush3.bf16.msk.msra.mxu1 %vm3031_vm5, %v3199_v56  ;;  %vm683_vm12 = vmand %vm619_vm8, %vm651_vm9  ;;  %vm622_vm5 = vcmp.ge.s32.totalorder %v590_v21, 0  ;;  %vm654_vm8 = vcmp.lt.s32.totalorder %v590_v21, 8 }
 0x15e   :  { %vm684_vm1 = vmand %vm620_vm14, %vm652_vm2 }
 0x15f   :  { %vm3033_vm11 = vmpackc.low %vm684_vm1, %vm683_vm12  ;;  %vm4365_vm12 = vcmask 64512  }
 0x160   :  { %3034 = vmatprep.subr.msk.bf16.mxu1 %vm3033_vm11, %v3199_v56  ;;  %vm667_vm15 = vmand %vm603_vm10, %vm635_vm0  ;;  %vm605_vm0 = vcmp.ge.s32.totalorder %v573_v26, 0  ;;  %vm638_vm11 = vcmp.lt.s32.totalorder %v574_v45, 8 }
 0x161   :  { %vm668_vm13 = vmand %vm604_vm3, %vm636_vm4  ;;  %vm606_vm3 = vcmp.ge.s32.totalorder %v574_v45, 0  ;;  %vm637_vm4 = vcmp.lt.s32.totalorder %v573_v26, 8 }
 0x162   :  { %vm3035_vm9 = vmpackc.low %vm668_vm13, %vm667_vm15  ;;  %vm623_vm13 = vcmp.ge.s32.totalorder %v591_v12, 0 }
 0x163   :  { %3036 = vmatpush3.bf16.msk.msra.mxu1 %vm3035_vm9, %v3199_v56  ;;  %vm685_vm2 = vmand %vm621_vm7, %vm653_vm6 }
 0x164   :  { %vm686_vm14 = vmand %vm622_vm5, %vm654_vm8  ;;  %vm655_vm8 = vcmp.lt.s32.totalorder %v591_v12, 8  ;;  %v4007_v12 = vld [vmem:[%s4203_s7 + $0x10] sm:$0xff] }
 0x165   :  { %vm3037_vm1 = vmpackc.low %vm686_vm14, %vm685_vm2  ;;  %vm607_vm14 = vcmp.ge.s32.totalorder %v575_v38, 0 }
 0x166   :  { %3038 = vmatprep.subr.msk.bf16.mxu1 %vm3037_vm1, %v3199_v56  ;;  %vm4366_vm10 = vmmov %vm4365_vm12  ;;  %vm639_vm1 = vcmp.lt.s32.totalorder %v575_v38, 8  ;;  %v4032_v38 = vld [vmem:[%s4203_s7 + $0x30] sm:$0xff] }
 0x167   :  { %vm669_vm15 = vmand %vm605_vm0, %vm637_vm4  ;;  %vm640_vm0 = vcmp.lt.s32.totalorder %v576_v7, 8 }
 0x168   :  { %vm670_vm7 = vmand %vm606_vm3, %vm638_vm11 }
 0x169   :  { %vm3039_vm6 = vmpackc.low %vm670_vm7, %vm669_vm15  ;;  %vm1208_vm15 = vcmask 261120  }
 0x16a   :  { %3040 = vmatpush3.bf16.msk.msra.mxu1 %vm3039_vm6, %v3199_v56  ;;  %vm687_vm2 = vmand %vm623_vm13, %vm655_vm8  ;;  %vm1392_vm6 = vcmask 130048  }
 0x16b   :  { %vm671_vm4 = vmand %vm607_vm14, %vm639_vm1 }
 0x1fb   :  { %v929_v48 = vpop.f32.mrb[0].mxu1 }
 0x1fc   :  { %v931_v16 = vpop.f32.mrb[1].mxu1  ;;  %v940_v5 = vmul.f32 %v929_v48, %v3718_v2 }
 0x1fd   :  { %v941_v13 = vmul.f32 %v931_v16, %v4373_v11 }
 0x1ff   :  { %v935_v6 = vpop.f32.mrb[2].mxu1 }
 0x200   :  { %v937_v3 = vpop.f32.mrb[3].mxu1  ;;  %v942_v50 = vmul.f32 %v935_v6, %v3732_v18  ;;  %v1198_v18 = vld [vmem:[%s4199_s3 + $0x8] sm:$0xff] }
 0x21b   :  { %v2666_v60 = vpop.f32.mrb[4].mxu1 }
 0x21c   :  { %v2667_v4 = vpop.f32.mrb[5].mxu1 }
 0x21d   :  { %v2668_v52 = vadd.f32 %v2667_v4, %v2666_v60  ;;  %v1384_v4 = vld [vmem:[%s4203_s7] sm:$0xff] }
 0x21f   :  { %v1027_v55 = vmax.f32 %v2668_v52, 1e-24  ;;  %v2669_v29 = vpop.f32.mrb[6].mxu1  ;;  %v1523_v52 = vld [vmem:[%s4204_s8] sm:$0xff] }
 0x220   :  { %v2670_v24 = vpop.f32.mrb[7].mxu1 }
 0x221   :  { %3169 = vrsqrt.f32 %v1027_v55  ;;  %v2671_v25 = vadd.f32 %v2670_v24, %v2669_v29  ;;  %v1524_v55 = vld [vmem:[%s4204_s8 + $0x8] sm:$0xff]  ;;  %v1525_v29 = vld [vmem:[%s4204_s8 + $0x10] sm:$0xff] }
 0x222   :  { %v3065_v24 = vpack.c.bf16 %v1524_v55, %v1523_v52  ;;  %v2577_v55 = vld [vmem:[%s4206_s10 + $0x30] sm:$0xff] }
 0x223   :  { %v1028_v17 = vmax.f32 %v2671_v25, 1e-24  ;;  %v1526_v25 = vld [vmem:[%s4204_s8 + $0x18] sm:$0xff] }
 0x225   :  { %3171 = vrsqrt.f32 %v1028_v17  ;;  %v3069_v17 = vpack.c.bf16 %v1526_v25, %v1525_v29  ;;  %v2578_v29 = vld [vmem:[%s4206_s10 + $0x38] sm:$0xff] }
 0x22b   :  { %v3170_v30 = vpop.eup %3169 }
 0x22c   :  { %2495 = vmatmul.mubr.msk.f32.vlgmr.msra.gmra.mrb[4].mxu0 %vm4365_vm12, %v3170_v30  ;;  %v2532_v30 = vld [vmem:[%s4202_s6] ss:$0 sm:$0xff] }
 0x22d   :  { %1107 = vmatprep.mubr.f32.mxu0 %v4323_v49  ;;  %v592_v49 = vsub.s32 %v4370_v27, %v3856_v0  ;;  %v4016_v27 = vld [vmem:[%s4203_s7 + $0x18] sm:$0xff] }
 0x22f   :  { %v3172_v1 = vpop.eup %3171  ;;  %vm624_vm5 = vcmp.ge.s32.totalorder %v592_v49, 0  ;;  %vm656_vm9 = vcmp.lt.s32.totalorder %v592_v49, 8  ;;  %v1388_v49 = vld [vmem:[%s4203_s7 + $0x20] sm:$0xff] }
 0x230   :  { %2496 = vmatmul.mubr.msk.f32.gmra.mrb[6].mxu0 %vm4366_vm10, %v3172_v1  ;;  %vm688_vm12 = vmand %vm624_vm5, %vm656_vm9  ;;  %vm608_vm10 = vcmp.ge.s32.totalorder %v576_v7, 0  ;;  %v2546_v7 = vld [vmem:[%s4204_s8 + $0x20] sm:$0xff] }
 0x231   :  { %vm3041_vm3 = vmpackc.low %vm688_vm12, %vm687_vm2 }
 0x232   :  { %3042 = vmatprep.subr.msk.bf16.mxu1 %vm3041_vm3, %v3199_v56  ;;  %vm672_vm11 = vmand %vm608_vm10, %vm640_vm0 }
 0x233   :  { %vm3043_vm7 = vmpackc.low %vm672_vm11, %vm671_vm4 }
 0x234   :  { %3044 = vmatpush3.bf16.msk.msra.mxu1 %vm3043_vm7, %v3199_v56  ;;  %v943_v56 = vmul.f32 %v937_v3, %v4374_v59  ;;  %v2555_v59 = vld [vmem:[%s4204_s8 + $0x58] sm:$0xff] }
 0x235   :  { %3066 = vmatprep.subr.bf16.mxu1 %v3065_v24 }
 0x2ff   :  { %v1103_v0 = vpop.f32.mrb[4].mxu0 }
 0x300   :  { %v1114_v8 = vmul.f32 %v1103_v0, %v3831_v10  ;;  %v1105_v9 = vpop.f32.mrb[5].mxu0  ;;  %v2547_v0 = vld [vmem:[%s4204_s8 + $0x28] sm:$0xff] }
 0x301   :  { %v1115_v14 = vmul.f32 %v1105_v9, %v3756_v33  ;;  %v1197_v33 = vld [vmem:[%s4199_s3] sm:$0xff]  ;;  %v2549_v9 = vld [vmem:[%s4204_s8 + $0x38] sm:$0xff] }
 0x302   :  { %v1118_v15 = vadd.f32 %v1114_v8, %v940_v5  ;;  %v3073_v5 = vpack.c.bf16 %v2547_v0, %v2546_v7  ;;  %v2548_v8 = vld [vmem:[%s4204_s8 + $0x30] sm:$0xff]  ;;  %v2588_v7 = vld [vmem:[%s4206_s10 + $0x68] sm:$0xff] }
 0x303   :  { %v1119_v23 = vadd.f32 %v1115_v14, %v941_v13  ;;  %v1109_v47 = vpop.f32.mrb[6].mxu0  ;;  %v3077_v14 = vpack.c.bf16 %v2549_v9, %v2548_v8  ;;  %v2590_v8 = vld [vmem:[%s4206_s10 + $0x78] sm:$0xff] }
 0x304   :  { %v1116_v51 = vmul.f32 %v1109_v47, %v3851_v46  ;;  %v1111_v57 = vpop.f32.mrb[7].mxu0  ;;  %v3045_v46 = vpack.c.bf16 %v1198_v18, %v1197_v33  ;;  %v2559_v33 = vld [vmem:[%s4204_s8 + $0x68] sm:$0xff] }
 0x305   :  { %v1117_v62 = vmul.f32 %v1111_v57, %v3841_v35  ;;  %1186 = vmatprep.mubr.f32.mxu1 %v1119_v23  ;;  %v1199_v35 = vld [vmem:[%s4199_s3 + $0x10] sm:$0xff]  ;;  %v2553_v23 = vld [vmem:[%s4204_s8 + $0x48] sm:$0xff] }
 0x306   :  { %v1120_v2 = vadd.f32 %v1116_v51, %v942_v50  ;;  %1187 = vmatmul.mubr.f32.vlgmr.msra.gmra.mrb[8].mxu1 %v1118_v15  ;;  %3046 = vmatprep.subr.bf16.mxu0 %v3045_v46  ;;  %v3049_v32 = vpack.c.bf16 %v1200_v63, %v1199_v35  ;;  %v2552_v15 = vld [vmem:[%s4204_s8 + $0x40] sm:$0xff]  ;;  %v2554_v57 = vld [vmem:[%s4204_s8 + $0x50] sm:$0xff] }
 0x307   :  { %v1121_v10 = vadd.f32 %v1117_v62, %v943_v56  ;;  %3048 = vmatpush3.bf16.msra.mxu0 %v3045_v46  ;;  %3068 = vmatpush3.bf16.msra.mxu1 %v3065_v24  ;;  %v3081_v51 = vpack.c.bf16 %v2553_v23, %v2552_v15  ;;  %v3085_v62 = vpack.c.bf16 %v2555_v59, %v2554_v57  ;;  %v2560_v63 = vld [vmem:[%s4204_s8 + $0x70] sm:$0xff]  ;;  %v2574_v15 = vld [vmem:[%s4207_s11] ss:$0 sm:$0xff] }
 0x308   :  { %3050 = vmatprep.subr.bf16.mxu0 %v3049_v32  ;;  %3070 = vmatprep.subr.bf16.mxu1 %v3069_v17 }
 0x309   :  { %1191 = vmatprep.mubr.f32.mxu1 %v1121_v10  ;;  %v2558_v10 = vld [vmem:[%s4204_s8 + $0x60] sm:$0xff] }
 0x30a   :  { %1192 = vmatmul.mubr.f32.gmra.mrb[10].mxu1 %v1120_v2  ;;  %v3089_v46 = vpack.c.bf16 %v2559_v33, %v2558_v10 }
 0x30b   :  { %3052 = vmatpush3.bf16.msra.mxu0 %v3049_v32  ;;  %3072 = vmatpush3.bf16.msra.mxu1 %v3069_v17  ;;  %v2561_v32 = vld [vmem:[%s4204_s8 + $0x78] sm:$0xff] }
 0x30c   :  { %3054 = vmatprep.subr.bf16.mxu0 %v3053_v34  ;;  %3074 = vmatprep.subr.bf16.mxu1 %v3073_v5  ;;  %v3093_v53 = vpack.c.bf16 %v2561_v32, %v2560_v63 }
 0x3d9   :  { %v2704_v39 = vpop.f32.mrb[8].mxu1 }
 0x3da   :  { %v2705_v42 = vpop.f32.mrb[9].mxu1 }
 0x3db   :  { %v2706_v28 = vadd.f32 %v2705_v42, %v2704_v39 }
 0x3dd   :  { %v2707_v37 = vpop.f32.mrb[10].mxu1  ;;  %2804 = vmatprep.mubr.msk.f32.mxu0 %vm1208_vm15, %v2706_v28 }
 0x3de   :  { %v2708_v44 = vpop.f32.mrb[11].mxu1 }
 0x3df   :  { %v2709_v54 = vadd.f32 %v2708_v44, %v2707_v37  ;;  %v1988_v44 = vld [vmem:[%s4206_s10] sm:$0xff] }
 0x3e1   :  { %2805 = vmatmul.mubr.msk.f32.vlgmr.msra.gmra.mrb[8].mxu0 %vm1208_vm15, %v2709_v54  ;;  %v1989_v54 = vld [vmem:[%s4206_s10 + $0x8] sm:$0xff] }
 0x3e2   :  { %3056 = vmatpush3.bf16.msra.mxu0 %v3053_v34 }
 0x3e3   :  { %3058 = vmatprep.subr.bf16.mxu0 %v3057_v58 }
 0x3e6   :  { %3060 = vmatpush3.bf16.msra.mxu0 %v3057_v58  ;;  %v3101_v58 = vpack.c.bf16 %v1989_v54, %v1988_v44 }
 0x4b4   :  { %v2806_v21 = vpop.f32.mrb[8].mxu0 }
 0x4b5   :  { %v1287_v48 = vadd.f32 %v2806_v21, %v2529_v41  ;;  %v1281_v16 = vpop.f32.mrb[9].mxu0  ;;  %v1991_v21 = vld [vmem:[%s4206_s10 + $0x18] sm:$0xff] }
 0x4b6   :  { %v1282_v6 = vadd.f32 %v2529_v41, %v1281_v16  ;;  %v1990_v41 = vld [vmem:[%s4206_s10 + $0x10] sm:$0xff]  ;;  %v2575_v16 = vld [vmem:[%s4206_s10 + $0x20] sm:$0xff] }
 0x4b7   :  { %v1291_v60 = vmax.f32 %v1287_v48, 0.0  ;;  %v3105_v48 = vpack.c.bf16 %v1991_v21, %v1990_v41 }
 0x4b8   :  { %v1290_v3 = vmax.f32 %v1282_v6, 0.0  ;;  %v2576_v6 = vld [vmem:[%s4206_s10 + $0x28] sm:$0xff] }
 0x4ba   :  { %2815 = vmatprep.mubr.msk.f32.mxu0 %vm1208_vm15, %v1290_v3  ;;  %v3109_v3 = vpack.c.bf16 %v2576_v6, %v2575_v16 }
 0x4bb   :  { %2816 = vmatmul.mubr.msk.f32.vlgmr.msra.gmra.mrb[10].mxu0 %vm1208_vm15, %v1291_v60  ;;  %v2347_v60 = vld [vmem:[%s4208_s12] sm:$0xff] }
 0x4bc   :  { %2822 = vmatprep.mubr.msk.f32.mxu0 %vm1392_vm6, %v1384_v4 }
 0x58e   :  { %v2817_v1 = vpop.f32.mrb[10].mxu0 }
 0x58f   :  { %v1381_v20 = vadd.f32 %v2817_v1, %v2532_v30  ;;  %v1375_v26 = vpop.f32.mrb[11].mxu0 }
 0x590   :  { %v1376_v36 = vadd.f32 %v2532_v30, %v1375_v26  ;;  %v3113_v30 = vpack.c.bf16 %v2578_v29, %v2577_v55  ;;  %v2582_v26 = vld [vmem:[%s4206_s10 + $0x48] sm:$0xff] }
 0x592   :  { %v3061_v45 = vpack.c.bf16 %v1381_v20, %v1376_v36  ;;  %v2581_v20 = vld [vmem:[%s4206_s10 + $0x40] sm:$0xff] }
 0x594   :  { %3062 = vmatprep.subr.bf16.mxu0 %v3061_v45 }
 0x595   :  { %3064 = vmatpush3.bf16.msra.mxu0 %v3061_v45 }
 0x598   :  { %2823 = vmatmul.mubr.msk.f32.vlgmr.msra.gmra.mrb[12].mxu0 %vm1392_vm6, %v4002_v61 }
 0x599   :  { %2825 = vmatprep.mubr.msk.f32.mxu0 %vm1392_vm6, %v4007_v12 }
 0x59c   :  { %2826 = vmatmul.mubr.msk.f32.gmra.mrb[14].mxu0 %vm1392_vm6, %v4016_v27 }
 0x59d   :  { %2828 = vmatprep.mubr.msk.f32.mxu0 %vm1392_vm6, %v1388_v49 }
 0x5a0   :  { %2829 = vmatmul.mubr.msk.f32.gmra.mrb[16].mxu0 %vm1392_vm6, %v4027_v31 }
 0x5a1   :  { %2831 = vmatprep.mubr.msk.f32.mxu0 %vm1392_vm6, %v4032_v38 }
 0x5a4   :  { %2832 = vmatmul.mubr.msk.f32.gmra.mrb[18].mxu0 %vm1392_vm6, %v4041_v43 }
 0x5a5   :  { %2882 = vmatprep.mubr.msk.f32.mxu0 %vm1392_vm6, %v1384_v4  ;;  %v2348_v4 = vld [vmem:[%s4208_s12 + $0x8] sm:$0xff] }
 0x5a6   :  { %v3133_v52 = vpack.c.bf16 %v2348_v4, %v2347_v60 }
 0x66b   :  { %v2824_v11 = vpop.f32.mrb[12].mxu0 }
 0x66c   :  { %v1483_v13 = vpop.f32.mrb[13].mxu0 }
 0x66d   :  { %2842 = vmatprep.mubr.msk.f32.mxu1 %vm1208_vm15, %v1483_v13  ;;  %v2350_v13 = vld [vmem:[%s4208_s12 + $0x18] sm:$0xff] }
 0x66e   :  { %2843 = vmatmul.mubr.msk.f32.vlgmr.msra.gmra.mrb[12].mxu1 %vm1208_vm15, %v2824_v11  ;;  %v2349_v11 = vld [vmem:[%s4208_s12 + $0x10] sm:$0xff]  ;;  %s3200_s12 = smov [#allocation2]  }
 0x66f   :  { %3076 = vmatpush3.bf16.msra.mxu1 %v3073_v5  ;;  %v2827_v47 = vpop.f32.mrb[14].mxu0  ;;  %v2589_v5 = vld [vmem:[%s4206_s10 + $0x70] sm:$0xff]  ;;  %s2446_s23 = sshll.u32 %s3200_s12, 4  ;;  %s2447_s23 = int_to_ptr.vmem [resolvable:$true] %s2446_s23 }
 0x670   :  { %3078 = vmatprep.subr.bf16.mxu1 %v3077_v14  ;;  %v1493_v50 = vpop.f32.mrb[15].mxu0  ;;  %v3129_v9 = vpack.c.bf16 %v2590_v8, %v2589_v5  ;;  %s3173_s11 = scalar_lea.vmem %s2447_s23, 256  ;;  %p3178_p1 = scmp.lt.s32.totalorder %s2447_s23, %s2447_s23 }
 0x671   :  { %2853 = vmatprep.mubr.msk.f32.mxu1 %vm1208_vm15, %v1493_v50  ;;  %p3174_p0 = scmp.ne.s32.totalorder %s2447_s23, %s3173_s11  ;;  %p3179_p2 = scmp.lt.s32.totalorder %s3173_s11, %s3173_s11 }
 0x673   :  { %3080 = vmatpush3.bf16.msra.mxu1 %v3077_v14  ;;  %v2830_v56 = vpop.f32.mrb[16].mxu0  ;;  %v3137_v14 = vpack.c.bf16 %v2350_v13, %v2349_v11  ;;  %p3180_p3 = por %p3179_p2, %p3178_p1 }
 0x674   :  { %3082 = vmatprep.subr.bf16.mxu1 %v3081_v51  ;;  %v1503_v2 = vpop.f32.mrb[17].mxu0 }
 0x675   :  { %p3181_p4 = pnand %p3180_p3, %p3174_p0 }
 0x676   :  { %2854 = vmatmul.mubr.msk.f32.vlgmr.msra.gmra.mrb[12].mxu1 %vm1208_vm15, %v2827_v47 }
 0x677   :  { %3084 = vmatpush3.bf16.msra.mxu1 %v3081_v51  ;;  %2864 = vmatprep.mubr.msk.f32.mxu1 %vm1208_vm15, %v1503_v2  ;;  %v2833_v18 = vpop.f32.mrb[18].mxu0 }
 0x678   :  { %3086 = vmatprep.subr.bf16.mxu1 %v3085_v62  ;;  %v1513_v35 = vpop.f32.mrb[19].mxu0 }
 0x67b   :  { %3088 = vmatpush3.bf16.msra.mxu1 %v3085_v62 }
 0x67c   :  { %3090 = vmatprep.subr.bf16.mxu1 %v3089_v46 }
 0x67e   :  { %2865 = vmatmul.mubr.msk.f32.vlgmr.msra.gmra.mrb[12].mxu1 %vm1208_vm15, %v2830_v56  ;;  %v2593_v56 = vld [vmem:[%s4209_s13] ss:$0 sm:$0xff] }
 0x67f   :  { %3092 = vmatpush3.bf16.msra.mxu1 %v3089_v46  ;;  %2875 = vmatprep.mubr.msk.f32.mxu1 %vm1208_vm15, %v1513_v35 }
 0x680   :  { %3094 = vmatprep.subr.bf16.mxu1 %v3093_v53 }
 0x683   :  { %3096 = vmatpush3.bf16.msra.mxu1 %v3093_v53 }
 0x686   :  { %2876 = vmatmul.mubr.msk.f32.vlgmr.msra.gmra.mrb[12].mxu1 %vm1208_vm15, %v2833_v18 }
 0x687   :  { %2888 = vmatprep.mubr.msk.f32.mxu1 %vm1392_vm6, %v1388_v49  ;;  %v2583_v49 = vld [vmem:[%s4206_s10 + $0x50] sm:$0xff] }
 0x759   :  { %v2877_v34 = vpop.f32.mrb[12].mxu1 }
 0x75a   :  { %v3143_v39 = vadd.f32 %v2877_v34, %v2545_v22  ;;  %v1869_v42 = vpop.f32.mrb[13].mxu1 }
 0x75b   :  { %v3144_v28 = vadd.f32 %v2545_v22, %v1869_v42 }
 0x75c   :  { %v1881_v37 = vmax.f32 %v3143_v39, 0.0 }
 0x75d   :  { %v1880_v40 = vmax.f32 %v3144_v28, 0.0 }
 0x75f   :  { %v3097_v19 = vpack.c.bf16 %v1881_v37, %v1880_v40 }
 0x761   :  { %3098 = vmatprep.subr.bf16.mxu0 %v3097_v19  ;;  %3141 = vmatprep.subr.bf16.mxu1 %v3097_v19 }
 0x762   :  { %3100 = vmatpush3.bf16.msra.mxu0 %v3097_v19  ;;  %3142 = vmatpush3.bf16.msra.mxu1 %v3097_v19 }
 0x763   :  { %3102 = vmatprep.subr.bf16.mxu0 %v3101_v58  ;;  %3134 = vmatprep.subr.bf16.mxu1 %v3133_v52 }
 0x765   :  { %2883 = vmatmul.mubr.msk.f32.vlgmr.msra.gmra.mrb[20].mxu0 %vm1392_vm6, %v4002_v61  ;;  %2889 = vmatmul.mubr.msk.f32.vlgmr.msra.gmra.mrb[14].mxu1 %vm1392_vm6, %v4027_v31  ;;  %v2584_v31 = vld [vmem:[%s4206_s10 + $0x58] sm:$0xff] }
 0x766   :  { %2885 = vmatprep.mubr.msk.f32.mxu0 %vm1392_vm6, %v4007_v12  ;;  %2891 = vmatprep.mubr.msk.f32.mxu1 %vm1392_vm6, %v4032_v38  ;;  %v3117_v12 = vpack.c.bf16 %v2582_v26, %v2581_v20  ;;  %v3121_v38 = vpack.c.bf16 %v2584_v31, %v2583_v49 }
 0x767   :  { %3104 = vmatpush3.bf16.msra.mxu0 %v3101_v58  ;;  %3136 = vmatpush3.bf16.msra.mxu1 %v3133_v52 }
 0x768   :  { %3106 = vmatprep.subr.bf16.mxu0 %v3105_v48  ;;  %3138 = vmatprep.subr.bf16.mxu1 %v3137_v14 }
 0x769   :  { %2886 = vmatmul.mubr.msk.f32.gmra.mrb[22].mxu0 %vm1392_vm6, %v4016_v27  ;;  %2892 = vmatmul.mubr.msk.f32.gmra.mrb[16].mxu1 %vm1392_vm6, %v4041_v43  ;;  %v2587_v43 = vld [vmem:[%s4206_s10 + $0x60] sm:$0xff] }
 0x76a   :  { %v3125_v0 = vpack.c.bf16 %v2588_v7, %v2587_v43 }
 0x76b   :  { %3108 = vmatpush3.bf16.msra.mxu0 %v3105_v48  ;;  %3140 = vmatpush3.bf16.msra.mxu1 %v3137_v14 }
 0x76c   :  { %3110 = vmatprep.subr.bf16.mxu0 %v3109_v3 }
 0x838   :  { %v2884_v24 = vpop.f32.mrb[20].mxu0  ;;  %v2890_v25 = vpop.f32.mrb[14].mxu1 }
 0x839   :  { %v1948_v17 = vpop.f32.mrb[21].mxu0  ;;  %v1968_v1 = vpop.f32.mrb[15].mxu1 }
 0x83a   :  { %2902 = vmatprep.mubr.msk.f32.mxu0 %vm1208_vm15, %v1948_v17 }
 0x83b   :  { %2903 = vmatmul.mubr.msk.f32.vlgmr.msra.gmra.mrb[24].mxu0 %vm1208_vm15, %v2884_v24 }
 0x83c   :  { %3112 = vmatpush3.bf16.msra.mxu0 %v3109_v3  ;;  %v2887_v36 = vpop.f32.mrb[22].mxu0  ;;  %v2893_v45 = vpop.f32.mrb[16].mxu1 }
 0x83d   :  { %3114 = vmatprep.subr.bf16.mxu0 %v3113_v30  ;;  %v1958_v61 = vpop.f32.mrb[23].mxu0  ;;  %v1978_v27 = vpop.f32.mrb[17].mxu1 }
 0x83e   :  { %2913 = vmatprep.mubr.msk.f32.mxu0 %vm1208_vm15, %v1958_v61 }
 0x840   :  { %3116 = vmatpush3.bf16.msra.mxu0 %v3113_v30 }
 0x841   :  { %3118 = vmatprep.subr.bf16.mxu0 %v3117_v12 }
 0x843   :  { %2914 = vmatmul.mubr.msk.f32.vlgmr.msra.gmra.mrb[24].mxu0 %vm1208_vm15, %v2887_v36 }
 0x844   :  { %3120 = vmatpush3.bf16.msra.mxu0 %v3117_v12  ;;  %2924 = vmatprep.mubr.msk.f32.mxu0 %vm1208_vm15, %v1968_v1 }
 0x845   :  { %3122 = vmatprep.subr.bf16.mxu0 %v3121_v38 }
 0x848   :  { %3124 = vmatpush3.bf16.msra.mxu0 %v3121_v38 }
 0x849   :  { %3126 = vmatprep.subr.bf16.mxu0 %v3125_v0 }
 0x84b   :  { %2925 = vmatmul.mubr.msk.f32.vlgmr.msra.gmra.mrb[24].mxu0 %vm1208_vm15, %v2890_v25 }
 0x84c   :  { %3128 = vmatpush3.bf16.msra.mxu0 %v3125_v0  ;;  %2935 = vmatprep.mubr.msk.f32.mxu0 %vm1208_vm15, %v1978_v27 }
 0x84d   :  { %3130 = vmatprep.subr.bf16.mxu0 %v3129_v9 }
 0x850   :  { %3132 = vmatpush3.bf16.msra.mxu0 %v3129_v9 }
 0x853   :  { %2936 = vmatmul.mubr.msk.f32.vlgmr.msra.gmra.mrb[24].mxu0 %vm1208_vm15, %v2893_v45 }
 0x926   :  { %v2937_v23 = vpop.f32.mrb[24].mxu0 }
 0x927   :  { %v3145_v47 = vadd.f32 %v2937_v23, %v2574_v15  ;;  %v2334_v50 = vpop.f32.mrb[25].mxu0 }
 0x928   :  { %v3146_v51 = vadd.f32 %v2574_v15, %v2334_v50 }
 0x929   :  { %v2346_v59 = vmax.f32 %v3145_v47, 0.0 }
 0x92a   :  { %v2345_v57 = vmax.f32 %v3146_v51, 0.0 }
 0x92c   :  { %2946 = vmatprep.mubr.msk.f32.mxu1 %vm1208_vm15, %v2345_v57 }
 0x92d   :  { %2947 = vmatmul.mubr.msk.f32.vlgmr.msra.gmra.mrb[18].mxu1 %vm1208_vm15, %v2346_v59 }
 0xa00   :  { %v2948_v62 = vpop.f32.mrb[18].mxu1 }
 0xa01   :  { %v2436_v2 = vadd.f32 %v2948_v62, %v2593_v56  ;;  %v2430_v10 = vpop.f32.mrb[19].mxu1 }
 0xa02   :  { %v2431_v33 = vadd.f32 %v2593_v56, %v2430_v10 }
 0xa03   :  { %2440 = vst.msk [vmem:[#allocation2 + $0x8] sm:$0xff] %vm1208_vm15, %v2436_v2 }
 0xa04   :  { %2439 = vst.msk [vmem:[#allocation2] sm:$0xff] %vm1208_vm15, %v2431_v33 }
 0xa05   :  { %3184 = shalt.err (!%p3181_p4)
}
 0xa06   :  { %s3185_s25 = scalar_lea.hbm %s4210_s14, 256 }
 0xa07   :  { %p3186_p5 = scmp.ne.s32.totalorder %s4210_s14, %s3185_s25  ;;  %p3189_p6 = scmp.lt.u32.totalorder %s3185_s25, %s4210_s14 }
 0xa09   :  { %p3191_p7 = pnand %p3189_p6, %p3186_p5 }
 0xa0b   :  { %3194 = shalt.err (!%p3191_p7)
}
 0xa0c   :  { %s3201_s2 = smov 128   ;;  %s3202_s4 = smov 8  }
 0xa0d   :  { %2452 = dma.vmem_to_hbm [thread:$0]  %s2447_s23, 256, %s4210_s14, [#allocation3], %s3201_s2, %s3201_s2, %s3202_s4  }
 0xa0e   :  { %3195 = dma.done.wait [#allocation3], 256  }
 0xa0f   :  { %3196 = vsyncadd [#allocation3], 4294967040 }
 0xa10   :  { %2456 = vsyncpa [#allocation3], 1 }

</bundles_post_ra>
